<compile_context>
chip_gen: v6e
topology: v6e:2x2x1
jax: 0.10.0
libtpu: 0.0.40
codegen_flags: <defaults>
</compile_context>

<pallas_src>
import functools

import jax
import jax.numpy as jnp
from jax.experimental import pallas as pl
from jax.experimental.pallas import tpu as pltpu


def _round_up(x, m):
    return ((x + m - 1) // m) * m


def mlp_kernel(x_ref,
               w1_ref, b1_ref,
               w2_ref, b2_ref,
               w3_ref, b3_ref,
               w4_ref, b4_ref,
               o_ref):
    # fc1_1 + ReLU  (bf16 inputs, f32 accumulation)
    h = jnp.dot(x_ref[...], w1_ref[...], preferred_element_type=jnp.float32)
    h = jnp.maximum(h + b1_ref[...], 0.0)
    # fc1_2 + ReLU
    h = jnp.dot(h.astype(jnp.bfloat16), w2_ref[...],
                preferred_element_type=jnp.float32)
    h = jnp.maximum(h + b2_ref[...], 0.0)
    # fc1_3 + ReLU
    h = jnp.dot(h.astype(jnp.bfloat16), w3_ref[...],
                preferred_element_type=jnp.float32)
    h = jnp.maximum(h + b3_ref[...], 0.0)
    # fc1_4 + softmax over the (lane-padded) feature axis.
    # Padded lanes carry bias = -1e30 and zero weight columns, so they
    # contribute exactly 0 to the softmax and the real lanes are unchanged.
    logits = jnp.dot(h.astype(jnp.bfloat16), w4_ref[...],
                     preferred_element_type=jnp.float32)
    logits = logits + b4_ref[...]
    m = jnp.max(logits, axis=-1, keepdims=True)
    e = jnp.exp(logits - m)
    denom = jnp.sum(e, axis=-1, keepdims=True)
    o_ref[...] = (e * pl.reciprocal(denom, approx=False)).astype(o_ref.dtype)


@functools.partial(jax.jit, static_argnames=("block_b",))
def fc_model_forward(x, params, *, block_b=256):
    """x: (B, 900) float32.  params: dict of weights/biases.  Returns (B, D_out)."""
    assert block_b % 8 == 0, "block_b must be a multiple of 8"
    B, D_in = x.shape
    w1, b1 = params["w1"], params["b1"]
    w2, b2 = params["w2"], params["b2"]
    w3, b3 = params["w3"], params["b3"]
    w4, b4 = params["w4"], params["b4"]
    D_out = w4.shape[1]

    # ---- layout padding (all done once in the wrapper) ----
    D_in_pad = _round_up(D_in, 128)          # 900 -> 1024: aligned K dim
    D_out_pad = _round_up(D_out, 128)        # lane-dense output block

    # Effective batch tile: never larger than the (8-rounded) batch.
    bb = min(block_b, _round_up(B, 8))
    B_pad = _round_up(B, bb)
    grid = (B_pad // bb,)

    # Pad x (batch rows + feature cols) and cast matmul operands to bf16.
    x_p = jnp.pad(x, ((0, B_pad - B), (0, D_in_pad - D_in))).astype(jnp.bfloat16)
    w1_p = jnp.pad(w1, ((0, D_in_pad - D_in), (0, 0))).astype(jnp.bfloat16)
    w2_p = w2.astype(jnp.bfloat16)
    w3_p = w3.astype(jnp.bfloat16)
    # Pad w4 columns with zeros; pad b4 with a large negative so the padded
    # logits softmax to exactly 0.
    w4_p = jnp.pad(w4, ((0, 0), (0, D_out_pad - D_out))).astype(jnp.bfloat16)
    b4_p = jnp.pad(b4, ((0, 0), (0, D_out_pad - D_out)),
                   constant_values=-1e30).astype(jnp.float32)

    def full_block(shape):
        # weights/biases: whole array resident in VMEM, same block every step
        return pl.BlockSpec(shape, lambda i: tuple(0 for _ in shape))

    out = pl.pallas_call(
        mlp_kernel,
        out_shape=jax.ShapeDtypeStruct((B_pad, D_out_pad), jnp.float32),
        grid_spec=pltpu.PrefetchScalarGridSpec(
            num_scalar_prefetch=0,
            grid=grid,
            in_specs=[
                pl.BlockSpec((bb, D_in_pad), lambda i: (i, 0)),   # x tile
                full_block(w1_p.shape), full_block(b1.shape),
                full_block(w2_p.shape), full_block(b2.shape),
                full_block(w3_p.shape), full_block(b3.shape),
                full_block(w4_p.shape), full_block(b4_p.shape),
            ],
            out_specs=pl.BlockSpec((bb, D_out_pad), lambda i: (i, 0)),
        ),
        compiler_params=pltpu.CompilerParams(
            dimension_semantics=("parallel",),
        ),
    )(x_p, w1_p, b1, w2_p, b2, w3_p, b3, w4_p, b4_p)

    return out[:B, :D_out]


def init_params(key, d_out):
    """Deterministic parameter init (Linear layers of FcModelNN)."""
    dims = [(900, 256), (256, 64), (64, 32), (32, d_out)]
    params = {}
    for idx, (d_in, d_o) in enumerate(dims, start=1):
        key, kw, kb = jax.random.split(key, 3)
        bound = 1.0 / jnp.sqrt(d_in)
        # weight stored (in, out); bias kept 2-D (1, out) for TPU-friendly layout
        params[f"w{idx}"] = jax.random.uniform(
            kw, (d_in, d_o), jnp.float32, minval=-bound, maxval=bound)
        params[f"b{idx}"] = jax.random.uniform(
            kb, (1, d_o), jnp.float32, minval=-bound, maxval=bound)
    return params


def reference_forward(x, params):
    """Plain-JAX f32 reference reproducing the PyTorch forward."""
    h = jax.nn.relu(x @ params["w1"] + params["b1"])
    h = jax.nn.relu(h @ params["w2"] + params["b2"])
    h = jax.nn.relu(h @ params["w3"] + params["b3"])
    logits = h @ params["w4"] + params["b4"]
    return jax.nn.softmax(logits, axis=-1)


if __name__ == "__main__":
    key = jax.random.PRNGKey(0)
    k_params, k_x = jax.random.split(key)

    D_out = 10
    B = 256          # two grid steps with block_b=128 (exercises v7x's 2 TCs)

    params = init_params(k_params, D_out)
    x = jax.random.normal(k_x, (B, 900), dtype=jnp.float32)

    out = fc_model_forward(x, params, block_b=128)
    out = jax.block_until_ready(out)

    ref = reference_forward(x, params)
    assert out.shape == (B, D_out)
    # bf16 matmul operands (f32 accumulation) -> loosened tolerance vs f32 ref.
    assert jnp.allclose(out, ref, atol=2e-2, rtol=0.0), "mismatch vs reference"
    assert jnp.allclose(jnp.sum(out, axis=-1), 1.0, atol=1e-4), \
        "softmax rows must sum to 1"

    print("KERNEL_OK")
</pallas_src>

<mosaic_0001>
module attributes {stable_mosaic.version = 11 : i64} {
  func.func @mlp_kernel(%arg0: i32, %arg1: memref<128x1024xbf16, #tpu.memory_space<vmem>>, %arg2: memref<1024x256xbf16, #tpu.memory_space<vmem>>, %arg3: memref<1x256xf32, #tpu.memory_space<vmem>>, %arg4: memref<256x64xbf16, #tpu.memory_space<vmem>>, %arg5: memref<1x64xf32, #tpu.memory_space<vmem>>, %arg6: memref<64x32xbf16, #tpu.memory_space<vmem>>, %arg7: memref<1x32xf32, #tpu.memory_space<vmem>>, %arg8: memref<32x128xbf16, #tpu.memory_space<vmem>>, %arg9: memref<1x128xf32, #tpu.memory_space<vmem>>, %arg10: memref<128x128xf32, #tpu.memory_space<vmem>>) attributes {dimension_semantics = [#tpu.dimension_semantics<parallel>], iteration_bounds = array<i64: 2>, scalar_prefetch = 0 : i64, scratch_operands = 0 : i64, tpu.core_type = #tpu.core_type<tc>, window_params = [{transform_indices = @transform_0, window_bounds = array<i64: 128, 1024>}, {pipeline_mode = #tpu.pipeline_mode<synchronous>, transform_indices = @transform_1, window_bounds = array<i64: 1024, 256>}, {pipeline_mode = #tpu.pipeline_mode<synchronous>, transform_indices = @transform_2, window_bounds = array<i64: 1, 256>}, {pipeline_mode = #tpu.pipeline_mode<synchronous>, transform_indices = @transform_3, window_bounds = array<i64: 256, 64>}, {pipeline_mode = #tpu.pipeline_mode<synchronous>, transform_indices = @transform_4, window_bounds = array<i64: 1, 64>}, {pipeline_mode = #tpu.pipeline_mode<synchronous>, transform_indices = @transform_5, window_bounds = array<i64: 64, 32>}, {pipeline_mode = #tpu.pipeline_mode<synchronous>, transform_indices = @transform_6, window_bounds = array<i64: 1, 32>}, {pipeline_mode = #tpu.pipeline_mode<synchronous>, transform_indices = @transform_7, window_bounds = array<i64: 32, 128>}, {pipeline_mode = #tpu.pipeline_mode<synchronous>, transform_indices = @transform_8, window_bounds = array<i64: 1, 128>}, {transform_indices = @transform_9, window_bounds = array<i64: 128, 128>}]} {
    %c0 = arith.constant 0 : index
    %c0_0 = arith.constant 0 : index
    %0 = vector.load %arg1[%c0, %c0_0] : memref<128x1024xbf16, #tpu.memory_space<vmem>>, vector<128x1024xbf16>
    %c0_1 = arith.constant 0 : index
    %c0_2 = arith.constant 0 : index
    %1 = vector.load %arg2[%c0_1, %c0_2] : memref<1024x256xbf16, #tpu.memory_space<vmem>>, vector<1024x256xbf16>
    %cst = arith.constant dense<0.000000e+00> : vector<128x256xf32>
    %2 = tpu.matmul %0, %1, %cst {dimension_numbers = #tpu.dot_dimension_numbers<[1], [0], [0], [1], [0, 0, 1, 1], [], []>} : vector<128x1024xbf16>, vector<1024x256xbf16>, vector<128x256xf32> -> vector<128x256xf32>
    %c0_3 = arith.constant 0 : index
    %c0_4 = arith.constant 0 : index
    %3 = vector.load %arg3[%c0_3, %c0_4] : memref<1x256xf32, #tpu.memory_space<vmem>>, vector<1x256xf32>
    %4 = vector.broadcast %3 : vector<1x256xf32> to vector<128x256xf32>
    %5 = arith.addf %2, %4 : vector<128x256xf32>
    %cst_5 = arith.constant 0.000000e+00 : f32
    %6 = vector.broadcast %cst_5 : f32 to vector<128x256xf32>
    %7 = arith.maximumf %5, %6 : vector<128x256xf32>
    %8 = arith.truncf %7 : vector<128x256xf32> to vector<128x256xbf16>
    %c0_6 = arith.constant 0 : index
    %c0_7 = arith.constant 0 : index
    %9 = vector.load %arg4[%c0_6, %c0_7] : memref<256x64xbf16, #tpu.memory_space<vmem>>, vector<256x64xbf16>
    %cst_8 = arith.constant dense<0.000000e+00> : vector<128x64xf32>
    %10 = tpu.matmul %8, %9, %cst_8 {dimension_numbers = #tpu.dot_dimension_numbers<[1], [0], [0], [1], [0, 0, 1, 1], [], []>} : vector<128x256xbf16>, vector<256x64xbf16>, vector<128x64xf32> -> vector<128x64xf32>
    %c0_9 = arith.constant 0 : index
    %c0_10 = arith.constant 0 : index
    %11 = vector.load %arg5[%c0_9, %c0_10] : memref<1x64xf32, #tpu.memory_space<vmem>>, vector<1x64xf32>
    %12 = vector.broadcast %11 : vector<1x64xf32> to vector<128x64xf32>
    %13 = arith.addf %10, %12 : vector<128x64xf32>
    %cst_11 = arith.constant 0.000000e+00 : f32
    %14 = vector.broadcast %cst_11 : f32 to vector<128x64xf32>
    %15 = arith.maximumf %13, %14 : vector<128x64xf32>
    %16 = arith.truncf %15 : vector<128x64xf32> to vector<128x64xbf16>
    %c0_12 = arith.constant 0 : index
    %c0_13 = arith.constant 0 : index
    %17 = vector.load %arg6[%c0_12, %c0_13] : memref<64x32xbf16, #tpu.memory_space<vmem>>, vector<64x32xbf16>
    %cst_14 = arith.constant dense<0.000000e+00> : vector<128x32xf32>
    %18 = tpu.matmul %16, %17, %cst_14 {dimension_numbers = #tpu.dot_dimension_numbers<[1], [0], [0], [1], [0, 0, 1, 1], [], []>} : vector<128x64xbf16>, vector<64x32xbf16>, vector<128x32xf32> -> vector<128x32xf32>
    %c0_15 = arith.constant 0 : index
    %c0_16 = arith.constant 0 : index
    %19 = vector.load %arg7[%c0_15, %c0_16] : memref<1x32xf32, #tpu.memory_space<vmem>>, vector<1x32xf32>
    %20 = vector.broadcast %19 : vector<1x32xf32> to vector<128x32xf32>
    %21 = arith.addf %18, %20 : vector<128x32xf32>
    %cst_17 = arith.constant 0.000000e+00 : f32
    %22 = vector.broadcast %cst_17 : f32 to vector<128x32xf32>
    %23 = arith.maximumf %21, %22 : vector<128x32xf32>
    %24 = arith.truncf %23 : vector<128x32xf32> to vector<128x32xbf16>
    %c0_18 = arith.constant 0 : index
    %c0_19 = arith.constant 0 : index
    %25 = vector.load %arg8[%c0_18, %c0_19] : memref<32x128xbf16, #tpu.memory_space<vmem>>, vector<32x128xbf16>
    %cst_20 = arith.constant dense<0.000000e+00> : vector<128x128xf32>
    %26 = tpu.matmul %24, %25, %cst_20 {dimension_numbers = #tpu.dot_dimension_numbers<[1], [0], [0], [1], [0, 0, 1, 1], [], []>} : vector<128x32xbf16>, vector<32x128xbf16>, vector<128x128xf32> -> vector<128x128xf32>
    %c0_21 = arith.constant 0 : index
    %c0_22 = arith.constant 0 : index
    %27 = vector.load %arg9[%c0_21, %c0_22] : memref<1x128xf32, #tpu.memory_space<vmem>>, vector<1x128xf32>
    %28 = vector.broadcast %27 : vector<1x128xf32> to vector<128x128xf32>
    %29 = arith.addf %26, %28 : vector<128x128xf32>
    %cst_23 = arith.constant dense<0xFF800000> : vector<128xf32>
    %30 = vector.multi_reduction <maximumf>, %29, %cst_23 [1] : vector<128x128xf32> to vector<128xf32>
    %31 = vector.shape_cast %30 : vector<128xf32> to vector<128x1xf32>
    %32 = vector.broadcast %31 : vector<128x1xf32> to vector<128x128xf32>
    %33 = arith.subf %29, %32 : vector<128x128xf32>
    %34 = math.exp %33 : vector<128x128xf32>
    %cst_24 = arith.constant dense<0.000000e+00> : vector<128xf32>
    %35 = vector.multi_reduction <add>, %34, %cst_24 [1] : vector<128x128xf32> to vector<128xf32>
    %36 = vector.shape_cast %35 : vector<128xf32> to vector<128x1xf32>
    %37 = tpu.reciprocal %36 : vector<128x1xf32> -> vector<128x1xf32>
    %38 = vector.broadcast %37 : vector<128x1xf32> to vector<128x128xf32>
    %39 = arith.mulf %34, %38 : vector<128x128xf32>
    %c0_25 = arith.constant 0 : index
    %c0_26 = arith.constant 0 : index
    %40 = vector.load %arg10[%c0_25, %c0_26] : memref<128x128xf32, #tpu.memory_space<vmem>>, vector<128x128xf32>
    tpu.vector_store %arg10[%c0_25, %c0_26], %39 {strides = array<i32>} : memref<128x128xf32, #tpu.memory_space<vmem>>, vector<128x128xf32>,
    return
  }
  func.func @transform_0(%arg0: i32) -> (i32, i32) {
    %c0_i32 = arith.constant 0 : i32
    %c0_i32_0 = arith.constant 0 : i32
    return %arg0, %c0_i32 : i32, i32
  }
  func.func @transform_1(%arg0: i32) -> (i32, i32) {
    %c0_i32 = arith.constant 0 : i32
    %c0_i32_0 = arith.constant 0 : i32
    %c0_i32_1 = arith.constant 0 : i32
    return %c0_i32, %c0_i32_0 : i32, i32
  }
  func.func @transform_2(%arg0: i32) -> (i32, i32) {
    %c0_i32 = arith.constant 0 : i32
    %c0_i32_0 = arith.constant 0 : i32
    %c0_i32_1 = arith.constant 0 : i32
    return %c0_i32, %c0_i32_0 : i32, i32
  }
  func.func @transform_3(%arg0: i32) -> (i32, i32) {
    %c0_i32 = arith.constant 0 : i32
    %c0_i32_0 = arith.constant 0 : i32
    %c0_i32_1 = arith.constant 0 : i32
    return %c0_i32, %c0_i32_0 : i32, i32
  }
  func.func @transform_4(%arg0: i32) -> (i32, i32) {
    %c0_i32 = arith.constant 0 : i32
    %c0_i32_0 = arith.constant 0 : i32
    %c0_i32_1 = arith.constant 0 : i32
    return %c0_i32, %c0_i32_0 : i32, i32
  }
  func.func @transform_5(%arg0: i32) -> (i32, i32) {
    %c0_i32 = arith.constant 0 : i32
    %c0_i32_0 = arith.constant 0 : i32
    %c0_i32_1 = arith.constant 0 : i32
    return %c0_i32, %c0_i32_0 : i32, i32
  }
  func.func @transform_6(%arg0: i32) -> (i32, i32) {
    %c0_i32 = arith.constant 0 : i32
    %c0_i32_0 = arith.constant 0 : i32
    %c0_i32_1 = arith.constant 0 : i32
    return %c0_i32, %c0_i32_0 : i32, i32
  }
  func.func @transform_7(%arg0: i32) -> (i32, i32) {
    %c0_i32 = arith.constant 0 : i32
    %c0_i32_0 = arith.constant 0 : i32
    %c0_i32_1 = arith.constant 0 : i32
    return %c0_i32, %c0_i32_0 : i32, i32
  }
  func.func @transform_8(%arg0: i32) -> (i32, i32) {
    %c0_i32 = arith.constant 0 : i32
    %c0_i32_0 = arith.constant 0 : i32
    %c0_i32_1 = arith.constant 0 : i32
    return %c0_i32, %c0_i32_0 : i32, i32
  }
  func.func @transform_9(%arg0: i32) -> (i32, i32) {
    %c0_i32 = arith.constant 0 : i32
    %c0_i32_0 = arith.constant 0 : i32
    return %arg0, %c0_i32 : i32, i32
  }
}

</mosaic_0001>

<bundles_post_ra>
// kernel: fc_model_forward.1
= control target key start
LH: loop header
LB: loop body
LE: loop exit
PB: predicated region body
PF: predicated region fallthrough
CT: control target
= control target key end

     0   :  { %s3526_s30 = smov 0   ;;  %s4409_s0 = inlined_call_operand.vmem [shape: bf16[256,1024], index: 0, kind: input, shape index: {}]   ;;  %s4410_s1 = inlined_call_operand.vmem [shape: bf16[1024,256], index: 1, kind: input, shape index: {}]   ;;  %s4411_s2 = inlined_call_operand.vmem [shape: f32[1,256], index: 2, kind: input, shape index: {}]   ;;  %s4412_s3 = inlined_call_operand.vmem [shape: bf16[256,64], index: 3, kind: input, shape index: {}]   ;;  %s4413_s4 = inlined_call_operand.vmem [shape: f32[1,64], index: 4, kind: input, shape index: {}]   ;;  %s4414_s5 = inlined_call_operand.vmem [shape: bf16[64,32], index: 5, kind: input, shape index: {}]   ;;  %s4415_s6 = inlined_call_operand.vmem [shape: f32[1,32], index: 6, kind: input, shape index: {}]   ;;  %s4416_s7 = inlined_call_operand.vmem [shape: bf16[32,128], index: 7, kind: input, shape index: {}]   ;;  %s4417_s8 = inlined_call_operand.vmem [shape: f32[1,128], index: 8, kind: input, shape index: {}]   ;;  %s4418_s9 = inlined_call_operand.vmem [shape: f32[256,128], index: 9, kind: output, shape index: {}]  }
   0x1 LB: > { %s2806_s10 = sadd.s32 4294967295, %s3474_s30   ;;  %p2810_p0 = scmp.ge.s32.totalorder %s3474_s30, 1  ;;  %s3474_s30 = sphi %s3526_s30, %s19_s30  }
   0x2   : > { %p289_p1 = scmp.lt.s32.totalorder %s3474_s30, 3 }
   0x4   : > { %p290_p2 = pnand %p2810_p0, %p289_p1 }
   0x6   : > { %293 = sbr.rel (%p290_p2) target bundleno = 1333 (0x535), region = 56 }
   0xb   : > { %v3190_v0 = vld [vmem:[%s4410_s1 + $0x74] ss:$8 sps:$4 sm:$0xff]   ;;  %v3194_v2 = vld [vmem:[%s4410_s1 + $0x70] ss:$8 sps:$4 sm:$0xff]   ;;  %v3196_v4 = vld [vmem:[%s4410_s1 + $0x64] ss:$8 sps:$4 sm:$0xff]  }
   0xc   : > { %v3192_v1 = vld [vmem:[%s4410_s1 + $0x174] ss:$8 sps:$4 sm:$0xff]   ;;  %1504 = vmatprep.subr.bf16.mxu0 %v3190_v0  ;;  %v3195_v3 = vld [vmem:[%s4410_s1 + $0x170] ss:$8 sps:$4 sm:$0xff]   ;;  %v3198_v5 = vld [vmem:[%s4410_s1 + $0x164] ss:$8 sps:$4 sm:$0xff]  }
   0xd   : > { %1617 = vmatprep.subr.bf16.mxu1 %v3192_v1  ;;  %1505 = vmatpush1.bf16.msra.mxu0 %v3194_v2  ;;  %v3200_v6 = vld [vmem:[%s4410_s1 + $0x60] ss:$8 sps:$4 sm:$0xff]   ;;  %v3202_v8 = vld [vmem:[%s4410_s1 + $0x54] ss:$8 sps:$4 sm:$0xff]   ;;  %v3206_v10 = vld [vmem:[%s4410_s1 + $0x50] ss:$8 sps:$4 sm:$0xff]  }
   0xe   : > { %1618 = vmatpush1.bf16.msra.mxu1 %v3195_v3  ;;  %1506 = vmatprep.subr.bf16.mxu0 %v3196_v4  ;;  %v3201_v7 = vld [vmem:[%s4410_s1 + $0x160] ss:$8 sps:$4 sm:$0xff]   ;;  %v3204_v9 = vld [vmem:[%s4410_s1 + $0x154] ss:$8 sps:$4 sm:$0xff]   ;;  %v3207_v11 = vld [vmem:[%s4410_s1 + $0x150] ss:$8 sps:$4 sm:$0xff]  }
   0xf   : > { %1619 = vmatprep.subr.bf16.mxu1 %v3198_v5  ;;  %v3208_v12 = vld [vmem:[%s4410_s1 + $0x44] ss:$8 sps:$4 sm:$0xff]   ;;  %v3212_v14 = vld [vmem:[%s4410_s1 + $0x40] ss:$8 sps:$4 sm:$0xff]   ;;  %v3214_v16 = vld [vmem:[%s4410_s1 + $0x34] ss:$8 sps:$4 sm:$0xff]  }
  0x10   : > { %v3210_v13 = vld [vmem:[%s4410_s1 + $0x144] ss:$8 sps:$4 sm:$0xff]   ;;  %v3213_v15 = vld [vmem:[%s4410_s1 + $0x140] ss:$8 sps:$4 sm:$0xff]   ;;  %v3216_v17 = vld [vmem:[%s4410_s1 + $0x134] ss:$8 sps:$4 sm:$0xff]  }
  0x11   : > { %1507 = vmatpush1.bf16.msra.mxu0 %v3200_v6  ;;  %v3218_v18 = vld [vmem:[%s4410_s1 + $0x30] ss:$8 sps:$4 sm:$0xff]   ;;  %v3220_v20 = vld [vmem:[%s4410_s1 + $0x24] ss:$8 sps:$4 sm:$0xff]   ;;  %v3224_v22 = vld [vmem:[%s4410_s1 + $0x20] ss:$8 sps:$4 sm:$0xff]  }
  0x12   : > { %1620 = vmatpush1.bf16.msra.mxu1 %v3201_v7  ;;  %1508 = vmatprep.subr.bf16.mxu0 %v3202_v8  ;;  %v3219_v19 = vld [vmem:[%s4410_s1 + $0x130] ss:$8 sps:$4 sm:$0xff]   ;;  %v3222_v21 = vld [vmem:[%s4410_s1 + $0x124] ss:$8 sps:$4 sm:$0xff]   ;;  %v3225_v23 = vld [vmem:[%s4410_s1 + $0x120] ss:$8 sps:$4 sm:$0xff]  }
  0x13   : > { %1621 = vmatprep.subr.bf16.mxu1 %v3204_v9  ;;  %v3226_v24 = vld [vmem:[%s4410_s1 + $0x14] ss:$8 sps:$4 sm:$0xff]   ;;  %v3230_v26 = vld [vmem:[%s4410_s1 + $0x10] ss:$8 sps:$4 sm:$0xff]   ;;  %v3232_v28 = vld [vmem:[%s4410_s1 + $0x4] ss:$8 sps:$4 sm:$0xff]  }
  0x14   : > { %v3228_v25 = vld [vmem:[%s4410_s1 + $0x114] ss:$8 sps:$4 sm:$0xff]   ;;  %v3231_v27 = vld [vmem:[%s4410_s1 + $0x110] ss:$8 sps:$4 sm:$0xff]   ;;  %v3234_v29 = vld [vmem:[%s4410_s1 + $0x104] ss:$8 sps:$4 sm:$0xff]  }
  0x15   : > { %1509 = vmatpush1.bf16.msra.mxu0 %v3206_v10  ;;  %s2811_s14 = sshll.u32 %s2806_s10, 4  ;;  %v3236_v30 = vld [vmem:[%s4410_s1] ss:$8 sps:$4 sm:$0xff]   ;;  %v3238_v32 = vld [vmem:[%s4410_s1 + $0xf4] ss:$8 sps:$4 sm:$0xff]   ;;  %vm2299_vm0 = vcmask 523264  }
  0x16   : > { %1622 = vmatpush1.bf16.msra.mxu1 %v3207_v11  ;;  %1510 = vmatprep.subr.bf16.mxu0 %v3208_v12  ;;  %v3237_v31 = vld [vmem:[%s4410_s1 + $0x100] ss:$8 sps:$4 sm:$0xff]   ;;  %p327_p3 = scmp.lt.s32.totalorder %s2811_s14, 31  ;;  %v3240_v33 = vld [vmem:[%s4410_s1 + $0x1f4] ss:$8 sps:$4 sm:$0xff]   ;;  %vm2468_vm1 = vcmask 261120  }
  0x17   : > { %1623 = vmatprep.subr.bf16.mxu1 %v3210_v13  ;;  %v3242_v34 = vld [vmem:[%s4410_s1 + $0xf0] ss:$8 sps:$4 sm:$0xff]   ;;  %v3244_v36 = vld [vmem:[%s4410_s1 + $0xe4] ss:$8 sps:$4 sm:$0xff]   ;;  %v3248_v38 = vld [vmem:[%s4410_s1 + $0xe0] ss:$8 sps:$4 sm:$0xff]  }
  0x18   : > { %v3243_v35 = vld [vmem:[%s4410_s1 + $0x1f0] ss:$8 sps:$4 sm:$0xff]   ;;  %s4430_s14 = smov (!%p327_p3, %s2811_s14), 31  ;;  %v3246_v37 = vld [vmem:[%s4410_s1 + $0x1e4] ss:$8 sps:$4 sm:$0xff]  }
  0x19   : > { %1511 = vmatpush1.bf16.msra.mxu0 %v3212_v14  ;;  %v3249_v39 = vld [vmem:[%s4410_s1 + $0x1e0] ss:$8 sps:$4 sm:$0xff]   ;;  %v3250_v40 = vld [vmem:[%s4410_s1 + $0xd4] ss:$8 sps:$4 sm:$0xff]   ;;  %s3051_s18 = sshll.u32 %s4430_s14, 5  ;;  %s2815_s29 = sshll.u32 %s4430_s14, 3 }
  0x1a   : > { %1624 = vmatpush1.bf16.msra.mxu1 %v3213_v15  ;;  %1512 = vmatprep.subr.bf16.mxu0 %v3214_v16  ;;  %v3252_v41 = vld [vmem:[%s4410_s1 + $0x1d4] ss:$8 sps:$4 sm:$0xff]   ;;  %v3254_v42 = vld [vmem:[%s4410_s1 + $0xd0] ss:$8 sps:$4 sm:$0xff]   ;;  %s3674_s26 = scalar_lea.vmem %s4409_s0, %s3051_s18  ;;  %v3256_v44 = vld [vmem:[%s4410_s1 + $0xc4] ss:$8 sps:$4 sm:$0xff]  }
  0x1b   : > { %1625 = vmatprep.subr.bf16.mxu1 %v3216_v17  ;;  %v3255_v43 = vld [vmem:[%s4410_s1 + $0x1d0] ss:$8 sps:$4 sm:$0xff]   ;;  %v3258_v45 = vld [vmem:[%s4410_s1 + $0x1c4] ss:$8 sps:$4 sm:$0xff]   ;;  %v3260_v46 = vld [vmem:[%s4410_s1 + $0xc0] ss:$8 sps:$4 sm:$0xff]  }
  0x1c   : > { %v3261_v47 = vld [vmem:[%s4410_s1 + $0x1c0] ss:$8 sps:$4 sm:$0xff]   ;;  %v3262_v52 = vld [vmem:[%s4410_s1 + $0xb4] ss:$8 sps:$4 sm:$0xff]   ;;  %v3266_v56 = vld [vmem:[%s4410_s1 + $0xb0] ss:$8 sps:$4 sm:$0xff]  }
  0x1d   : > { %1513 = vmatpush1.bf16.msra.mxu0 %v3218_v18  ;;  %v340_v48 = vld [vmem:[%s3674_s26] sm:$0xff]  ;;  %v341_v50 = vld [vmem:[%s3674_s26 + $0x8] sm:$0xff]  ;;  %v3264_v54 = vld [vmem:[%s4410_s1 + $0x1b4] ss:$8 sps:$4 sm:$0xff]  }
  0x1e   : > { %1626 = vmatpush1.bf16.msra.mxu1 %v3219_v19  ;;  %1514 = vmatprep.subr.bf16.mxu0 %v3220_v20  ;;  %v344_v49 = vld [vmem:[%s3674_s26 + $0x20] sm:$0xff]  ;;  %v345_v51 = vld [vmem:[%s3674_s26 + $0x28] sm:$0xff]  ;;  %v3267_v57 = vld [vmem:[%s4410_s1 + $0x1b0] ss:$8 sps:$4 sm:$0xff]  }
  0x1f   : > { %1627 = vmatprep.subr.bf16.mxu1 %v3222_v21  ;;  %v2817_v53 = vcombine.high %v340_v48, %v344_v49  ;;  %v2819_v55 = vcombine.high %v341_v50, %v345_v51  ;;  %v3268_v58 = vld [vmem:[%s4410_s1 + $0xa4] ss:$8 sps:$4 sm:$0xff]   ;;  %v3272_v60 = vld [vmem:[%s4410_s1 + $0xa0] ss:$8 sps:$4 sm:$0xff]   ;;  %v3274_v62 = vld [vmem:[%s4410_s1 + $0x94] ss:$8 sps:$4 sm:$0xff]   ;;  %v2816_v11 = vcombine.low %v340_v48, %v344_v49  ;;  %v2818_v12 = vcombine.low %v341_v50, %v345_v51 }
  0x20   : > { %v3270_v59 = vld [vmem:[%s4410_s1 + $0x1a4] ss:$8 sps:$4 sm:$0xff]   ;;  %v3273_v61 = vld [vmem:[%s4410_s1 + $0x1a0] ss:$8 sps:$4 sm:$0xff]   ;;  %v3276_v63 = vld [vmem:[%s4410_s1 + $0x194] ss:$8 sps:$4 sm:$0xff]  }
  0x21   : > { %1515 = vmatpush1.bf16.msra.mxu0 %v3224_v22  ;;  %1536 = vmatprep.mubr.bf16.mxu0 %v2817_v53  ;;  %v3278_v0 = vld [vmem:[%s4410_s1 + $0x90] ss:$8 sps:$4 sm:$0xff]   ;;  %v3280_v2 = vld [vmem:[%s4410_s1 + $0x84] ss:$8 sps:$4 sm:$0xff]   ;;  %v3284_v4 = vld [vmem:[%s4410_s1 + $0x80] ss:$8 sps:$4 sm:$0xff]  }
  0x22   : > { %1628 = vmatpush1.bf16.msra.mxu1 %v3225_v23  ;;  %1516 = vmatprep.subr.bf16.mxu0 %v3226_v24  ;;  %v3279_v1 = vld [vmem:[%s4410_s1 + $0x190] ss:$8 sps:$4 sm:$0xff]   ;;  %v3282_v3 = vld [vmem:[%s4410_s1 + $0x184] ss:$8 sps:$4 sm:$0xff]   ;;  %v3285_v5 = vld [vmem:[%s4410_s1 + $0x180] ss:$8 sps:$4 sm:$0xff]  }
  0x23   : > { %1629 = vmatprep.subr.bf16.mxu1 %v3228_v25  ;;  %1649 = vmatprep.mubr.bf16.mxu1 %v2819_v55  ;;  %v3288_v6 = vld [vmem:[%s4410_s1 + $0x274] ss:$8 sps:$4 sm:$0xff]   ;;  %v3286_v8 = vld [vmem:[%s4410_s1 + $0x270] ss:$8 sps:$4 sm:$0xff]   ;;  %v348_v10 = vld [vmem:[%s3674_s26 + $0x40] sm:$0xff] }
  0x24   : > { %v3291_v7 = vld [vmem:[%s4410_s1 + $0x374] ss:$8 sps:$4 sm:$0xff]   ;;  %v3289_v9 = vld [vmem:[%s4410_s1 + $0x370] ss:$8 sps:$4 sm:$0xff]   ;;  %v352_v13 = vld [vmem:[%s3674_s26 + $0x60] sm:$0xff] }
  0x25   : > { %1517 = vmatpush1.bf16.msra.mxu0 %v3230_v26  ;;  %v349_v14 = vld [vmem:[%s3674_s26 + $0x48] sm:$0xff]  ;;  %v2825_v18 = vcombine.high %v348_v10, %v352_v13  ;;  %v3300_v22 = vld [vmem:[%s4410_s1 + $0x254] ss:$8 sps:$4 sm:$0xff]   ;;  %v3298_v24 = vld [vmem:[%s4410_s1 + $0x250] ss:$8 sps:$4 sm:$0xff]  }
  0x26   : > { %1630 = vmatpush1.bf16.msra.mxu1 %v3231_v27  ;;  %1518 = vmatprep.subr.bf16.mxu0 %v3232_v28  ;;  %v353_v15 = vld [vmem:[%s3674_s26 + $0x68] sm:$0xff]  ;;  %v3303_v23 = vld [vmem:[%s4410_s1 + $0x354] ss:$8 sps:$4 sm:$0xff]   ;;  %v3301_v25 = vld [vmem:[%s4410_s1 + $0x350] ss:$8 sps:$4 sm:$0xff]   ;;  %v2824_v28 = vcombine.low %v348_v10, %v352_v13 }
  0x27   : > { %1631 = vmatprep.subr.bf16.mxu1 %v3234_v29  ;;  %v3294_v16 = vld [vmem:[%s4410_s1 + $0x264] ss:$8 sps:$4 sm:$0xff]   ;;  %v2827_v19 = vcombine.high %v349_v14, %v353_v15  ;;  %v3292_v20 = vld [vmem:[%s4410_s1 + $0x260] ss:$8 sps:$4 sm:$0xff]   ;;  %v2826_v29 = vcombine.low %v349_v14, %v353_v15  ;;  %v3327_v55 = vld [vmem:[%s4410_s1 + $0x314] ss:$8 sps:$4 sm:$0xff]  }
  0x28   : > { %v3297_v17 = vld [vmem:[%s4410_s1 + $0x364] ss:$8 sps:$4 sm:$0xff]   ;;  %v3295_v21 = vld [vmem:[%s4410_s1 + $0x360] ss:$8 sps:$4 sm:$0xff]   ;;  %v3334_v14 = vld [vmem:[%s4410_s1 + $0x2f0] ss:$8 sps:$4 sm:$0xff]  }
  0x29   : > { %1519 = vmatpush1.bf16.msra.mxu0 %v3236_v30  ;;  %v356_v26 = vld [vmem:[%s3674_s26 + $0x80] sm:$0xff]  ;;  %v357_v30 = vld [vmem:[%s3674_s26 + $0x88] sm:$0xff]  ;;  %v3337_v15 = vld [vmem:[%s4410_s1 + $0x3f0] ss:$8 sps:$4 sm:$0xff]  }
  0x2a   : > { %1632 = vmatpush1.bf16.msra.mxu1 %v3237_v31  ;;  %1520 = vmatprep.subr.bf16.mxu0 %v3238_v32  ;;  %v360_v27 = vld [vmem:[%s3674_s26 + $0xa0] sm:$0xff]  ;;  %v361_v31 = vld [vmem:[%s3674_s26 + $0xa8] sm:$0xff] }
  0x2b   : > { %1633 = vmatprep.subr.bf16.mxu1 %v3240_v33  ;;  %v3306_v32 = vld [vmem:[%s4410_s1 + $0x244] ss:$8 sps:$4 sm:$0xff]   ;;  %v3319_v53 = vld [vmem:[%s4410_s1 + $0x320] ss:$8 sps:$4 sm:$0xff]  }
  0x2c   : > { %v3309_v33 = vld [vmem:[%s4410_s1 + $0x344] ss:$8 sps:$4 sm:$0xff]  }
  0x2d   : > { %1521 = vmatpush2.bf16.msra.mxu0 %v3242_v34  ;;  %v2833_v34 = vcombine.high %v356_v26, %v360_v27  ;;  %v3318_v48 = vld [vmem:[%s4410_s1 + $0x224] ss:$8 sps:$4 sm:$0xff]  }
  0x2e   : > { %1634 = vmatpush2.bf16.msra.mxu1 %v3243_v35  ;;  %1522 = vmatprep.subr.bf16.mxu0 %v3244_v36  ;;  %v2835_v35 = vcombine.high %v357_v30, %v361_v31  ;;  %v3304_v36 = vld [vmem:[%s4410_s1 + $0x240] ss:$8 sps:$4 sm:$0xff]   ;;  %v3321_v49 = vld [vmem:[%s4410_s1 + $0x324] ss:$8 sps:$4 sm:$0xff]  }
  0x2f   : > { %1635 = vmatprep.subr.bf16.mxu1 %v3246_v37  ;;  %v3307_v37 = vld [vmem:[%s4410_s1 + $0x340] ss:$8 sps:$4 sm:$0xff]  }
  0x30   : > { %v385_v13 = vld [vmem:[%s3674_s26 + $0x168] sm:$0xff] }
  0x31   : > { %1523 = vmatpush2.bf16.msra.mxu0 %v3248_v38  ;;  %v3312_v38 = vld [vmem:[%s4410_s1 + $0x234] ss:$8 sps:$4 sm:$0xff]  }
  0x32   : > { %1636 = vmatpush2.bf16.msra.mxu1 %v3249_v39  ;;  %1524 = vmatprep.subr.bf16.mxu0 %v3250_v40  ;;  %v3315_v39 = vld [vmem:[%s4410_s1 + $0x334] ss:$8 sps:$4 sm:$0xff]   ;;  %v3310_v40 = vld [vmem:[%s4410_s1 + $0x230] ss:$8 sps:$4 sm:$0xff]  }
  0x33   : > { %1637 = vmatprep.subr.bf16.mxu1 %v3252_v41  ;;  %v3313_v41 = vld [vmem:[%s4410_s1 + $0x330] ss:$8 sps:$4 sm:$0xff]  }
  0x35   : > { %1525 = vmatpush2.bf16.msra.mxu0 %v3254_v42  ;;  %v364_v42 = vld [vmem:[%s3674_s26 + $0xc0] sm:$0xff] }
  0x36   : > { %1638 = vmatpush2.bf16.msra.mxu1 %v3255_v43  ;;  %1526 = vmatprep.subr.bf16.mxu0 %v3256_v44  ;;  %v368_v43 = vld [vmem:[%s3674_s26 + $0xe0] sm:$0xff]  ;;  %v2832_v44 = vcombine.low %v356_v26, %v360_v27 }
  0x37   : > { %1639 = vmatprep.subr.bf16.mxu1 %v3258_v45  ;;  %v2834_v45 = vcombine.low %v357_v30, %v361_v31  ;;  %v2841_v50 = vcombine.high %v364_v42, %v368_v43  ;;  %v392_v27 = vld [vmem:[%s3674_s26 + $0x1a0] sm:$0xff]  ;;  %v3346_v30 = vld [vmem:[%s4410_s1 + $0x2d0] ss:$8 sps:$4 sm:$0xff]  }
  0x38   : > { %v3349_v31 = vld [vmem:[%s4410_s1 + $0x3d0] ss:$8 sps:$4 sm:$0xff]  }
  0x39   : > { %1527 = vmatpush2.bf16.msra.mxu0 %v3260_v46  ;;  %v365_v46 = vld [vmem:[%s3674_s26 + $0xc8] sm:$0xff] }
  0x3a   : > { %1640 = vmatpush2.bf16.msra.mxu1 %v3261_v47  ;;  %1528 = vmatprep.subr.bf16.mxu0 %v3262_v52  ;;  %v369_v47 = vld [vmem:[%s3674_s26 + $0xe8] sm:$0xff] }
  0x3b   : > { %1641 = vmatprep.subr.bf16.mxu1 %v3264_v54  ;;  %v2843_v51 = vcombine.high %v365_v46, %v369_v47  ;;  %v3316_v52 = vld [vmem:[%s4410_s1 + $0x220] ss:$8 sps:$4 sm:$0xff]   ;;  %v3324_v54 = vld [vmem:[%s4410_s1 + $0x214] ss:$8 sps:$4 sm:$0xff]  }
  0x3d   : > { %1529 = vmatpush2.bf16.msra.mxu0 %v3266_v56  ;;  %v3322_v56 = vld [vmem:[%s4410_s1 + $0x210] ss:$8 sps:$4 sm:$0xff]  }
  0x3e   : > { %1642 = vmatpush2.bf16.msra.mxu1 %v3267_v57  ;;  %1530 = vmatprep.subr.bf16.mxu0 %v3268_v58  ;;  %v372_v57 = vld [vmem:[%s3674_s26 + $0x100] sm:$0xff] }
  0x3f   : > { %1643 = vmatprep.subr.bf16.mxu1 %v3270_v59  ;;  %v376_v58 = vld [vmem:[%s3674_s26 + $0x120] sm:$0xff]  ;;  %v2840_v59 = vcombine.low %v364_v42, %v368_v43  ;;  %v397_v42 = vld [vmem:[%s3674_s26 + $0x1c8] sm:$0xff] }
  0x40   : > { %v2848_v10 = vcombine.low %v372_v57, %v376_v58  ;;  %v401_v43 = vld [vmem:[%s3674_s26 + $0x1e8] sm:$0xff] }
  0x41   : > { %1531 = vmatpush2.bf16.msra.mxu0 %v3272_v60  ;;  %v2842_v60 = vcombine.low %v365_v46, %v369_v47 }
  0x42   : > { %1644 = vmatpush2.bf16.msra.mxu1 %v3273_v61  ;;  %1532 = vmatprep.subr.bf16.mxu0 %v3274_v62  ;;  %v373_v61 = vld [vmem:[%s3674_s26 + $0x108] sm:$0xff] }
  0x43   : > { %1645 = vmatprep.subr.bf16.mxu1 %v3276_v63  ;;  %v377_v62 = vld [vmem:[%s3674_s26 + $0x128] sm:$0xff]  ;;  %v3325_v63 = vld [vmem:[%s4410_s1 + $0x310] ss:$8 sps:$4 sm:$0xff]  }
  0x45   : > { %1533 = vmatpush2.bf16.msra.mxu0 %v3278_v0  ;;  %v3330_v0 = vld [vmem:[%s4410_s1 + $0x204] ss:$8 sps:$4 sm:$0xff]  }
  0x46   : > { %1646 = vmatpush2.bf16.msra.mxu1 %v3279_v1  ;;  %1534 = vmatprep.subr.bf16.mxu0 %v3280_v2  ;;  %v3333_v1 = vld [vmem:[%s4410_s1 + $0x304] ss:$8 sps:$4 sm:$0xff]   ;;  %v2849_v2 = vcombine.high %v372_v57, %v376_v58  ;;  %v346_v57 = vld [vmem:[%s3674_s26 + $0x30] sm:$0xff]  ;;  %v343_v58 = vld [vmem:[%s3674_s26 + $0x18] sm:$0xff] }
  0x47   : > { %1647 = vmatprep.subr.bf16.mxu1 %v3282_v3  ;;  %v2851_v3 = vcombine.high %v373_v61, %v377_v62 }
  0x49   : > { %1535 = vmatpush2.bf16.msra.mxu0 %v3284_v4  ;;  %v3328_v4 = vld [vmem:[%s4410_s1 + $0x200] ss:$8 sps:$4 sm:$0xff]  }
  0x4a   : > { %1648 = vmatpush2.bf16.msra.mxu1 %v3285_v5  ;;  %1730 = vmatprep.subr.bf16.mxu0 %v3288_v6  ;;  %v3331_v5 = vld [vmem:[%s4410_s1 + $0x300] ss:$8 sps:$4 sm:$0xff]   ;;  %v3336_v6 = vld [vmem:[%s4410_s1 + $0x2f4] ss:$8 sps:$4 sm:$0xff]  }
  0x4b   : > { %1843 = vmatprep.subr.bf16.mxu1 %v3291_v7  ;;  %v3339_v7 = vld [vmem:[%s4410_s1 + $0x3f4] ss:$8 sps:$4 sm:$0xff]  }
  0x4c   : > { %1537 = vmatmul.mubr.bf16.vlgmr.msra.gmra.mxu0 %v2816_v11  ;;  %v2850_v11 = vcombine.low %v373_v61, %v377_v62  ;;  %v3373_v61 = vld [vmem:[%s4410_s1 + $0x390] ss:$8 sps:$4 sm:$0xff]  }
  0x4d   : > { %1650 = vmatmul.mubr.bf16.vlgmr.msra.gmra.mxu1 %v2818_v12  ;;  %1731 = vmatpush1.bf16.msra.mxu0 %v3286_v8  ;;  %v380_v8 = vld [vmem:[%s3674_s26 + $0x140] sm:$0xff]  ;;  %v381_v12 = vld [vmem:[%s3674_s26 + $0x148] sm:$0xff] }
  0x4e   : > { %1844 = vmatpush1.bf16.msra.mxu1 %v3289_v9  ;;  %1732 = vmatprep.subr.bf16.mxu0 %v3294_v16  ;;  %v384_v9 = vld [vmem:[%s3674_s26 + $0x160] sm:$0xff]  ;;  %v2858_v26 = vcombine.low %v381_v12, %v385_v13 }
  0x4f   : > { %1845 = vmatprep.subr.bf16.mxu1 %v3297_v17  ;;  %1546 = vmatprep.mubr.bf16.mxu0 %v2825_v18  ;;  %v3342_v16 = vld [vmem:[%s4410_s1 + $0x2e4] ss:$8 sps:$4 sm:$0xff]   ;;  %v2857_v18 = vcombine.high %v380_v8, %v384_v9 }
  0x50   : > { %1659 = vmatprep.mubr.bf16.mxu1 %v2827_v19  ;;  %v3345_v17 = vld [vmem:[%s4410_s1 + $0x3e4] ss:$8 sps:$4 sm:$0xff]   ;;  %v2859_v19 = vcombine.high %v381_v12, %v385_v13 }
  0x51   : > { %1733 = vmatpush1.bf16.msra.mxu0 %v3292_v20  ;;  %v3340_v20 = vld [vmem:[%s4410_s1 + $0x2e0] ss:$8 sps:$4 sm:$0xff]  }
  0x52   : > { %1846 = vmatpush1.bf16.msra.mxu1 %v3295_v21  ;;  %1734 = vmatprep.subr.bf16.mxu0 %v3300_v22  ;;  %v3343_v21 = vld [vmem:[%s4410_s1 + $0x3e0] ss:$8 sps:$4 sm:$0xff]   ;;  %v3348_v22 = vld [vmem:[%s4410_s1 + $0x2d4] ss:$8 sps:$4 sm:$0xff]  }
  0x53   : > { %1847 = vmatprep.subr.bf16.mxu1 %v3303_v23  ;;  %v3351_v23 = vld [vmem:[%s4410_s1 + $0x3d4] ss:$8 sps:$4 sm:$0xff]  }
  0x54   : > { %1547 = vmatmul.mubr.bf16.gmra.mxu0 %v2824_v28  ;;  %v389_v28 = vld [vmem:[%s3674_s26 + $0x188] sm:$0xff] }
  0x55   : > { %1660 = vmatmul.mubr.bf16.gmra.mxu1 %v2826_v29  ;;  %1735 = vmatpush1.bf16.msra.mxu0 %v3298_v24  ;;  %v388_v24 = vld [vmem:[%s3674_s26 + $0x180] sm:$0xff]  ;;  %v393_v29 = vld [vmem:[%s3674_s26 + $0x1a8] sm:$0xff] }
  0x56   : > { %1848 = vmatpush1.bf16.msra.mxu1 %v3301_v25  ;;  %1736 = vmatprep.subr.bf16.mxu0 %v3306_v32  ;;  %v2856_v25 = vcombine.low %v380_v8, %v384_v9  ;;  %v3354_v32 = vld [vmem:[%s4410_s1 + $0x2c4] ss:$8 sps:$4 sm:$0xff]   ;;  %v2864_v46 = vcombine.low %v388_v24, %v392_v27  ;;  %v2866_v47 = vcombine.low %v389_v28, %v393_v29  ;;  %v351_v8 = vld [vmem:[%s3674_s26 + $0x58] sm:$0xff] }
  0x57   : > { %1849 = vmatprep.subr.bf16.mxu1 %v3309_v33  ;;  %1556 = vmatprep.mubr.bf16.mxu0 %v2833_v34  ;;  %v3357_v33 = vld [vmem:[%s4410_s1 + $0x3c4] ss:$8 sps:$4 sm:$0xff]   ;;  %v3352_v34 = vld [vmem:[%s4410_s1 + $0x2c0] ss:$8 sps:$4 sm:$0xff]   ;;  %v355_v9 = vld [vmem:[%s3674_s26 + $0x78] sm:$0xff] }
  0x58   : > { %1669 = vmatprep.mubr.bf16.mxu1 %v2835_v35  ;;  %v3355_v35 = vld [vmem:[%s4410_s1 + $0x3c0] ss:$8 sps:$4 sm:$0xff]   ;;  %v2831_v13 = vcombine.high %v351_v8, %v355_v9 }
  0x59   : > { %1737 = vmatpush1.bf16.msra.mxu0 %v3304_v36  ;;  %v2865_v36 = vcombine.high %v388_v24, %v392_v27  ;;  %v367_v24 = vld [vmem:[%s3674_s26 + $0xd8] sm:$0xff] }
  0x5a   : > { %1850 = vmatpush1.bf16.msra.mxu1 %v3307_v37  ;;  %1738 = vmatprep.subr.bf16.mxu0 %v3312_v38  ;;  %v2867_v37 = vcombine.high %v389_v28, %v393_v29  ;;  %v3360_v38 = vld [vmem:[%s4410_s1 + $0x2b4] ss:$8 sps:$4 sm:$0xff]  }
  0x5b   : > { %1851 = vmatprep.subr.bf16.mxu1 %v3315_v39  ;;  %v3363_v39 = vld [vmem:[%s4410_s1 + $0x3b4] ss:$8 sps:$4 sm:$0xff]  }
  0x5c   : > { %1557 = vmatmul.mubr.bf16.gmra.mxu0 %v2832_v44  ;;  %v3358_v44 = vld [vmem:[%s4410_s1 + $0x2b0] ss:$8 sps:$4 sm:$0xff]  }
  0x5d   : > { %1670 = vmatmul.mubr.bf16.gmra.mxu1 %v2834_v45  ;;  %1739 = vmatpush1.bf16.msra.mxu0 %v3310_v40  ;;  %v396_v40 = vld [vmem:[%s3674_s26 + $0x1c0] sm:$0xff]  ;;  %v3361_v45 = vld [vmem:[%s4410_s1 + $0x3b0] ss:$8 sps:$4 sm:$0xff]  }
  0x5e   : > { %1852 = vmatpush1.bf16.msra.mxu1 %v3313_v41  ;;  %1740 = vmatprep.subr.bf16.mxu0 %v3318_v48  ;;  %v400_v41 = vld [vmem:[%s3674_s26 + $0x1e0] sm:$0xff] }
  0x5f   : > { %1853 = vmatprep.subr.bf16.mxu1 %v3321_v49  ;;  %1566 = vmatprep.mubr.bf16.mxu0 %v2841_v50  ;;  %v3366_v48 = vld [vmem:[%s4410_s1 + $0x2a4] ss:$8 sps:$4 sm:$0xff]   ;;  %v3364_v50 = vld [vmem:[%s4410_s1 + $0x2a0] ss:$8 sps:$4 sm:$0xff]   ;;  %v2872_v62 = vcombine.low %v396_v40, %v400_v41 }
  0x60   : > { %1679 = vmatprep.mubr.bf16.mxu1 %v2843_v51  ;;  %v3369_v49 = vld [vmem:[%s4410_s1 + $0x3a4] ss:$8 sps:$4 sm:$0xff]   ;;  %v3367_v51 = vld [vmem:[%s4410_s1 + $0x3a0] ss:$8 sps:$4 sm:$0xff]  }
  0x61   : > { %1741 = vmatpush1.bf16.msra.mxu0 %v3316_v52  ;;  %v2873_v52 = vcombine.high %v396_v40, %v400_v41  ;;  %v382_v40 = vld [vmem:[%s3674_s26 + $0x150] sm:$0xff] }
  0x62   : > { %1854 = vmatpush1.bf16.msra.mxu1 %v3319_v53  ;;  %1742 = vmatprep.subr.bf16.mxu0 %v3324_v54  ;;  %v2875_v53 = vcombine.high %v397_v42, %v401_v43  ;;  %v3372_v54 = vld [vmem:[%s4410_s1 + $0x294] ss:$8 sps:$4 sm:$0xff]  }
  0x63   : > { %1855 = vmatprep.subr.bf16.mxu1 %v3327_v55  ;;  %v3375_v55 = vld [vmem:[%s4410_s1 + $0x394] ss:$8 sps:$4 sm:$0xff]  }
  0x64   : > { %1567 = vmatmul.mubr.bf16.gmra.mxu0 %v2840_v59  ;;  %v347_v59 = vld [vmem:[%s3674_s26 + $0x38] sm:$0xff]  ;;  %v386_v41 = vld [vmem:[%s3674_s26 + $0x170] sm:$0xff] }
  0x65   : > { %1680 = vmatmul.mubr.bf16.gmra.mxu1 %v2842_v60  ;;  %1743 = vmatpush1.bf16.msra.mxu0 %v3322_v56  ;;  %v342_v56 = vld [vmem:[%s3674_s26 + $0x10] sm:$0xff] }
  0x66   : > { %1856 = vmatpush1.bf16.msra.mxu1 %v3325_v63  ;;  %1744 = vmatprep.subr.bf16.mxu0 %v3330_v0  ;;  %v3370_v60 = vld [vmem:[%s4410_s1 + $0x290] ss:$8 sps:$4 sm:$0xff]   ;;  %v2874_v63 = vcombine.low %v397_v42, %v401_v43  ;;  %v3378_v0 = vld [vmem:[%s4410_s1 + $0x284] ss:$8 sps:$4 sm:$0xff]  }
  0x67   : > { %1857 = vmatprep.subr.bf16.mxu1 %v3333_v1  ;;  %1576 = vmatprep.mubr.bf16.mxu0 %v2849_v2  ;;  %v3381_v1 = vld [vmem:[%s4410_s1 + $0x384] ss:$8 sps:$4 sm:$0xff]   ;;  %v2821_v2 = vcombine.high %v342_v56, %v346_v57  ;;  %v383_v42 = vld [vmem:[%s3674_s26 + $0x158] sm:$0xff] }
  0x68   : > { %1689 = vmatprep.mubr.bf16.mxu1 %v2851_v3  ;;  %v2823_v3 = vcombine.high %v343_v58, %v347_v59  ;;  %v387_v43 = vld [vmem:[%s3674_s26 + $0x178] sm:$0xff] }
  0x69   : > { %1745 = vmatpush1.bf16.msra.mxu0 %v3328_v4  ;;  %v3376_v4 = vld [vmem:[%s4410_s1 + $0x280] ss:$8 sps:$4 sm:$0xff]  }
  0x6a   : > { %1858 = vmatpush1.bf16.msra.mxu1 %v3331_v5  ;;  %1746 = vmatprep.subr.bf16.mxu0 %v3336_v6  ;;  %v3379_v5 = vld [vmem:[%s4410_s1 + $0x380] ss:$8 sps:$4 sm:$0xff]   ;;  %v350_v6 = vld [vmem:[%s3674_s26 + $0x50] sm:$0xff] }
  0x6b   : > { %1859 = vmatprep.subr.bf16.mxu1 %v3339_v7  ;;  %v354_v7 = vld [vmem:[%s3674_s26 + $0x70] sm:$0xff] }
  0x6c   : > { %1577 = vmatmul.mubr.bf16.gmra.mxu0 %v2848_v10  ;;  %v2820_v10 = vcombine.low %v342_v56, %v346_v57  ;;  %v2829_v12 = vcombine.high %v350_v6, %v354_v7  ;;  %v2860_v56 = vcombine.low %v382_v40, %v386_v41  ;;  %v2862_v57 = vcombine.low %v383_v42, %v387_v43 }
  0x6d   : > { %1690 = vmatmul.mubr.bf16.gmra.mxu1 %v2850_v11  ;;  %1747 = vmatpush2.bf16.msra.mxu0 %v3334_v14  ;;  %v2822_v11 = vcombine.low %v343_v58, %v347_v59  ;;  %v358_v14 = vld [vmem:[%s3674_s26 + $0x90] sm:$0xff] }
  0x6e   : > { %1860 = vmatpush2.bf16.msra.mxu1 %v3337_v15  ;;  %1748 = vmatprep.subr.bf16.mxu0 %v3342_v16  ;;  %v362_v15 = vld [vmem:[%s3674_s26 + $0xb0] sm:$0xff]  ;;  %v359_v16 = vld [vmem:[%s3674_s26 + $0x98] sm:$0xff] }
  0x6f   : > { %1861 = vmatprep.subr.bf16.mxu1 %v3345_v17  ;;  %1586 = vmatprep.mubr.bf16.mxu0 %v2857_v18  ;;  %v363_v17 = vld [vmem:[%s3674_s26 + $0xb8] sm:$0xff]  ;;  %v2828_v18 = vcombine.low %v350_v6, %v354_v7 }
  0x70   : > { %1699 = vmatprep.mubr.bf16.mxu1 %v2859_v19  ;;  %v2830_v19 = vcombine.low %v351_v8, %v355_v9  ;;  %v2838_v27 = vcombine.low %v359_v16, %v363_v17  ;;  %v3390_v6 = vld [vmem:[%s4412_s3 + $0x58] sm:$0xff]  }
  0x71   : > { %1749 = vmatpush2.bf16.msra.mxu0 %v3340_v20  ;;  %v2837_v20 = vcombine.high %v358_v14, %v362_v15  ;;  %v3391_v7 = vld [vmem:[%s4412_s3 + $0x18] sm:$0xff]  }
  0x72   : > { %1862 = vmatpush2.bf16.msra.mxu1 %v3343_v21  ;;  %1750 = vmatprep.subr.bf16.mxu0 %v3348_v22  ;;  %v2839_v21 = vcombine.high %v359_v16, %v363_v17  ;;  %v366_v22 = vld [vmem:[%s3674_s26 + $0xd0] sm:$0xff]  ;;  %v534_v16 = vlaneseq }
  0x73   : > { %1863 = vmatprep.subr.bf16.mxu1 %v3351_v23  ;;  %v370_v23 = vld [vmem:[%s3674_s26 + $0xf0] sm:$0xff] }
  0x74   : > { %1587 = vmatmul.mubr.bf16.gmra.mxu0 %v2856_v25  ;;  %v371_v25 = vld [vmem:[%s3674_s26 + $0xf8] sm:$0xff]  ;;  %v2845_v28 = vcombine.high %v366_v22, %v370_v23  ;;  %v535_v17 = vshrl.u32 %v534_v16, 7 }
  0x75   : > { %1700 = vmatmul.mubr.bf16.gmra.mxu1 %v2858_v26  ;;  %1751 = vmatpush2.bf16.msra.mxu0 %v3346_v30  ;;  %v2836_v26 = vcombine.low %v358_v14, %v362_v15  ;;  %v2847_v29 = vcombine.high %v367_v24, %v371_v25  ;;  %v374_v30 = vld [vmem:[%s3674_s26 + $0x110] sm:$0xff]  ;;  %v3396_v14 = vld [vmem:[%s4412_s3 + $0x40] sm:$0xff]  }
  0x76   : > { %1864 = vmatpush2.bf16.msra.mxu1 %v3349_v31  ;;  %1752 = vmatprep.subr.bf16.mxu0 %v3354_v32  ;;  %v378_v31 = vld [vmem:[%s3674_s26 + $0x130] sm:$0xff]  ;;  %v375_v32 = vld [vmem:[%s3674_s26 + $0x118] sm:$0xff]  ;;  %v3397_v15 = vld [vmem:[%s4412_s3] sm:$0xff]  }
  0x77   : > { %1865 = vmatprep.subr.bf16.mxu1 %v3357_v33  ;;  %1596 = vmatprep.mubr.bf16.mxu0 %v2865_v36  ;;  %v379_v33 = vld [vmem:[%s3674_s26 + $0x138] sm:$0xff]  ;;  %v2844_v36 = vcombine.low %v366_v22, %v370_v23 }
  0x78   : > { %1709 = vmatprep.mubr.bf16.mxu1 %v2867_v37  ;;  %v2846_v37 = vcombine.low %v367_v24, %v371_v25 }
  0x79   : > { %1753 = vmatpush2.bf16.msra.mxu0 %v3352_v34  ;;  %v3382_v34 = vld [vmem:[%s4412_s3 + $0x78] sm:$0xff]  }
  0x7a   : > { %1866 = vmatpush2.bf16.msra.mxu1 %v3355_v35  ;;  %1754 = vmatprep.subr.bf16.mxu0 %v3360_v38  ;;  %v3383_v35 = vld [vmem:[%s4412_s3 + $0x38] sm:$0xff]   ;;  %v2853_v38 = vcombine.high %v374_v30, %v378_v31 }
  0x7b   : > { %1867 = vmatprep.subr.bf16.mxu1 %v3363_v39  ;;  %v2855_v39 = vcombine.high %v375_v32, %v379_v33 }
  0x7c   : > { %1597 = vmatmul.mubr.bf16.gmra.mxu0 %v2864_v46  ;;  %v2852_v46 = vcombine.low %v374_v30, %v378_v31 }
  0x7d   : > { %1710 = vmatmul.mubr.bf16.gmra.mxu1 %v2866_v47  ;;  %1755 = vmatpush2.bf16.msra.mxu0 %v3358_v44  ;;  %v3384_v44 = vld [vmem:[%s4412_s3 + $0x70] sm:$0xff]   ;;  %v2854_v47 = vcombine.low %v375_v32, %v379_v33 }
  0x7e   : > { %1868 = vmatpush2.bf16.msra.mxu1 %v3361_v45  ;;  %1756 = vmatprep.subr.bf16.mxu0 %v3366_v48  ;;  %v3385_v45 = vld [vmem:[%s4412_s3 + $0x30] sm:$0xff]   ;;  %v2861_v48 = vcombine.high %v382_v40, %v386_v41 }
  0x7f   : > { %1869 = vmatprep.subr.bf16.mxu1 %v3369_v49  ;;  %1606 = vmatprep.mubr.bf16.mxu0 %v2873_v52  ;;  %v2863_v49 = vcombine.high %v383_v42, %v387_v43  ;;  %v391_v52 = vld [vmem:[%s3674_s26 + $0x198] sm:$0xff] }
  0x80   : > { %1719 = vmatprep.mubr.bf16.mxu1 %v2875_v53  ;;  %v395_v53 = vld [vmem:[%s3674_s26 + $0x1b8] sm:$0xff] }
  0x81   : > { %1757 = vmatpush2.bf16.msra.mxu0 %v3364_v50  ;;  %v390_v50 = vld [vmem:[%s3674_s26 + $0x190] sm:$0xff]  ;;  %v2871_v59 = vcombine.high %v391_v52, %v395_v53 }
  0x82   : > { %1870 = vmatpush2.bf16.msra.mxu1 %v3367_v51  ;;  %1758 = vmatprep.subr.bf16.mxu0 %v3372_v54  ;;  %v394_v51 = vld [vmem:[%s3674_s26 + $0x1b0] sm:$0xff]  ;;  %v3386_v54 = vld [vmem:[%s4412_s3 + $0x68] sm:$0xff]  }
  0x83   : > { %1871 = vmatprep.subr.bf16.mxu1 %v3375_v55  ;;  %v3387_v55 = vld [vmem:[%s4412_s3 + $0x28] sm:$0xff]   ;;  %v2869_v58 = vcombine.high %v390_v50, %v394_v51 }
  0x84   : > { %1607 = vmatmul.mubr.bf16.gmra.mxu0 %v2872_v62  ;;  %v399_v62 = vld [vmem:[%s3674_s26 + $0x1d8] sm:$0xff] }
  0x85   : > { %1720 = vmatmul.mubr.bf16.gmra.mxu1 %v2874_v63  ;;  %1759 = vmatpush2.bf16.msra.mxu0 %v3370_v60  ;;  %v398_v60 = vld [vmem:[%s3674_s26 + $0x1d0] sm:$0xff]  ;;  %v403_v63 = vld [vmem:[%s3674_s26 + $0x1f8] sm:$0xff] }
  0x86   : > { %1872 = vmatpush2.bf16.msra.mxu1 %v3373_v61  ;;  %1760 = vmatprep.subr.bf16.mxu0 %v3378_v0  ;;  %v402_v61 = vld [vmem:[%s3674_s26 + $0x1f0] sm:$0xff]  ;;  %v3388_v0 = vld [vmem:[%s4412_s3 + $0x60] sm:$0xff]   ;;  %v2878_v9 = vcombine.low %v399_v62, %v403_v63  ;;  %s4372_s26 = scalar_lea.vmem %s4418_s9, %s2815_s29 }
  0x87   : > { %1873 = vmatprep.subr.bf16.mxu1 %v3381_v1  ;;  %1762 = vmatprep.mubr.bf16.mxu0 %v2821_v2  ;;  %v3389_v1 = vld [vmem:[%s4412_s3 + $0x20] sm:$0xff]   ;;  %v2868_v2 = vcombine.low %v390_v50, %v394_v51  ;;  %v2876_v8 = vcombine.low %v398_v60, %v402_v61 }
  0x88   : > { %1875 = vmatprep.mubr.bf16.mxu1 %v2823_v3  ;;  %v2870_v3 = vcombine.low %v391_v52, %v395_v53 }
  0x89   : > { %1761 = vmatpush2.bf16.msra.mxu0 %v3376_v4  ;;  %v2877_v4 = vcombine.high %v398_v60, %v402_v61 }
  0x8a   : > { %1874 = vmatpush2.bf16.msra.mxu1 %v3379_v5  ;;  %3052 = vmatprep.subr.bf16.mxu0 %v3382_v34  ;;  %v2879_v5 = vcombine.high %v399_v62, %v403_v63 }
  0x8c   : > { %1763 = vmatmul.mubr.bf16.vlgmr.msra.gmra.mxu0 %v2820_v10  ;;  %v3392_v10 = vld [vmem:[%s4412_s3 + $0x50] sm:$0xff]  }
  0x8d   : > { %1876 = vmatmul.mubr.bf16.vlgmr.msra.gmra.mxu1 %v2822_v11  ;;  %1772 = vmatprep.mubr.bf16.mxu0 %v2829_v12  ;;  %v3393_v11 = vld [vmem:[%s4412_s3 + $0x10] sm:$0xff]   ;;  %v3394_v12 = vld [vmem:[%s4412_s3 + $0x48] sm:$0xff]  }
  0x8e   : > { %1885 = vmatprep.mubr.bf16.mxu1 %v2831_v13  ;;  %3053 = vmatpush3.bf16.msra.mxu0 %v3383_v35  ;;  %v3395_v13 = vld [vmem:[%s4412_s3 + $0x8] sm:$0xff]  }
  0x8f   : > { %3054 = vmatprep.subr.bf16.mxu0 %v3384_v44 }
  0x92   : > { %3055 = vmatpush3.bf16.msra.mxu0 %v3385_v45 }
  0x93   : > { %3056 = vmatprep.subr.bf16.mxu0 %v3386_v54 }
  0x94   : > { %1773 = vmatmul.mubr.bf16.gmra.mxu0 %v2828_v18  ;;  %v536_v18 = vsub.s32 0, %v535_v17 }
  0x95   : > { %1886 = vmatmul.mubr.bf16.gmra.mxu1 %v2830_v19  ;;  %1782 = vmatprep.mubr.bf16.mxu0 %v2837_v20  ;;  %v532_v19 = vld [vmem:[%s4411_s2] sm:$0x3]  ;;  %v540_v20 = vsub.s32 1, %v535_v17 }
  0x96   : > { %1895 = vmatprep.mubr.bf16.mxu1 %v2839_v21  ;;  %3057 = vmatpush3.bf16.msra.mxu0 %v3387_v55  ;;  %v4043_v21 = vrot.slane %v532_v19, %v536_v18 }
  0x97   : > { %3058 = vmatprep.subr.bf16.mxu0 %v3388_v0  ;;  %v4045_v22 = vrot.slane %v532_v19, %v540_v20 }
  0x9a   : > { %3059 = vmatpush3.bf16.msra.mxu0 %v3389_v1 }
  0x9b   : > { %3060 = vmatprep.subr.bf16.mxu0 %v3390_v6 }
  0x9c   : > { %1783 = vmatmul.mubr.bf16.gmra.mxu0 %v2836_v26 }
  0x9d   : > { %1896 = vmatmul.mubr.bf16.gmra.mxu1 %v2838_v27  ;;  %1792 = vmatprep.mubr.bf16.mxu0 %v2845_v28 }
  0x9e   : > { %1905 = vmatprep.mubr.bf16.mxu1 %v2847_v29  ;;  %3061 = vmatpush3.bf16.msra.mxu0 %v3391_v7 }
  0x9f   : > { %3062 = vmatprep.subr.bf16.mxu0 %v3392_v10 }
  0xa2   : > { %3063 = vmatpush3.bf16.msra.mxu0 %v3393_v11 }
  0xa3   : > { %3064 = vmatprep.subr.bf16.mxu0 %v3394_v12 }
  0xa4   : > { %1793 = vmatmul.mubr.bf16.gmra.mxu0 %v2844_v36 }
  0xa5   : > { %1906 = vmatmul.mubr.bf16.gmra.mxu1 %v2846_v37  ;;  %1802 = vmatprep.mubr.bf16.mxu0 %v2853_v38  ;;  %v3398_v37 = vld [vmem:[%s4414_s5 + $0x18] sm:$0xff]   ;;  %v3399_v38 = vld [vmem:[%s4414_s5 + $0x10] sm:$0xff]  }
  0xa6   : > { %1915 = vmatprep.mubr.bf16.mxu1 %v2855_v39  ;;  %3065 = vmatpush3.bf16.msra.mxu0 %v3395_v13 }
  0xa7   : > { %3066 = vmatprep.subr.bf16.mxu0 %v3396_v14  ;;  %3138 = vmatprep.subr.bf16.mxu1 %v3398_v37 }
  0xa8   : > { %3139 = vmatpush3.bf16.msra.mxu1 %v3398_v37 }
  0xa9   : > { %3140 = vmatprep.subr.bf16.mxu1 %v3399_v38 }
  0xaa   : > { %3067 = vmatpush3.bf16.msra.mxu0 %v3397_v15 }
  0xac   : > { %1803 = vmatmul.mubr.bf16.gmra.mxu0 %v2852_v46  ;;  %3141 = vmatpush3.bf16.msra.mxu1 %v3399_v38 }
  0xad   : > { %1916 = vmatmul.mubr.bf16.gmra.mxu1 %v2854_v47  ;;  %1812 = vmatprep.mubr.bf16.mxu0 %v2861_v48 }
  0xae   : > { %1925 = vmatprep.mubr.bf16.mxu1 %v2863_v49 }
  0xb4   : > { %1813 = vmatmul.mubr.bf16.gmra.mxu0 %v2860_v56 }
  0xb5   : > { %1926 = vmatmul.mubr.bf16.gmra.mxu1 %v2862_v57  ;;  %1822 = vmatprep.mubr.bf16.mxu0 %v2869_v58 }
  0xb6   : > { %1935 = vmatprep.mubr.bf16.mxu1 %v2871_v59 }
  0xbc   : > { %1823 = vmatmul.mubr.bf16.gmra.mxu0 %v2868_v2 }
  0xbd   : > { %1936 = vmatmul.mubr.bf16.gmra.mxu1 %v2870_v3  ;;  %1832 = vmatprep.mubr.bf16.mxu0 %v2877_v4 }
  0xbe   : > { %1945 = vmatprep.mubr.bf16.mxu1 %v2879_v5 }
  0xc4   : > { %1833 = vmatmul.mubr.bf16.gmra.mxu0 %v2876_v8 }
  0xc5   : > { %1946 = vmatmul.mubr.bf16.gmra.mxu1 %v2878_v9 }
 0x10c   : > { %v1538_v23 = vpop.f32.mrf.mxu0 }
 0x10d   : > { %v1651_v24 = vpop.f32.mrf.mxu1  ;;  %v1539_v25 = vadd.f32 %v1538_v23, %v4043_v21 }
 0x10e   : > { %v1540_v26 = vpop.f32.mrf.mxu0 }
 0x10f   : > { %v1653_v27 = vpop.f32.mrf.mxu1  ;;  %v4048_v28 = vadd.f32 %v1651_v24, %v1539_v25  ;;  %v1541_v29 = vadd.f32 %v1540_v26, %v4045_v22 }
 0x110   : > { %v4051_v30 = vpop.f32.mrf.mxu0 }
 0x111   : > { %v4053_v31 = vpop.f32.mrf.mxu1  ;;  %v4055_v32 = vadd.f32 %v1653_v27, %v1541_v29 }
 0x112   : > { %v4057_v33 = vpop.f32.mrf.mxu0 }
 0x113   : > { %v4059_v34 = vpop.f32.mrf.mxu1 }
 0x114   : > { %v1548_v35 = vpop.f32.mrf.mxu0 }
 0x115   : > { %v1661_v36 = vpop.f32.mrf.mxu1  ;;  %v1549_v39 = vadd.f32 %v1548_v35, %v4043_v21 }
 0x116   : > { %v1550_v40 = vpop.f32.mrf.mxu0 }
 0x117   : > { %v1663_v41 = vpop.f32.mrf.mxu1  ;;  %v4068_v42 = vadd.f32 %v1661_v36, %v1549_v39  ;;  %v1551_v43 = vadd.f32 %v1550_v40, %v4045_v22 }
 0x118   : > { %v4071_v44 = vpop.f32.mrf.mxu0 }
 0x119   : > { %v4073_v45 = vpop.f32.mrf.mxu1  ;;  %v4075_v46 = vadd.f32 %v1663_v41, %v1551_v43 }
 0x11a   : > { %v4077_v47 = vpop.f32.mrf.mxu0 }
 0x11b   : > { %v4079_v48 = vpop.f32.mrf.mxu1 }
 0x11c   : > { %v1558_v49 = vpop.f32.mrf.mxu0 }
 0x11d   : > { %v1671_v50 = vpop.f32.mrf.mxu1  ;;  %v1559_v51 = vadd.f32 %v1558_v49, %v4043_v21 }
 0x11e   : > { %v1560_v52 = vpop.f32.mrf.mxu0 }
 0x11f   : > { %v1673_v53 = vpop.f32.mrf.mxu1  ;;  %v4082_v54 = vadd.f32 %v1671_v50, %v1559_v51  ;;  %v1561_v55 = vadd.f32 %v1560_v52, %v4045_v22 }
 0x120   : > { %v4085_v56 = vpop.f32.mrf.mxu0 }
 0x121   : > { %v4087_v57 = vpop.f32.mrf.mxu1  ;;  %v4089_v58 = vadd.f32 %v1673_v53, %v1561_v55 }
 0x122   : > { %v4091_v59 = vpop.f32.mrf.mxu0 }
 0x123   : > { %v4093_v60 = vpop.f32.mrf.mxu1 }
 0x124   : > { %v1568_v61 = vpop.f32.mrf.mxu0 }
 0x125   : > { %v1681_v62 = vpop.f32.mrf.mxu1  ;;  %v1569_v63 = vadd.f32 %v1568_v61, %v4043_v21 }
 0x126   : > { %v1570_v0 = vpop.f32.mrf.mxu0 }
 0x127   : > { %v1683_v1 = vpop.f32.mrf.mxu1  ;;  %v4096_v2 = vadd.f32 %v1681_v62, %v1569_v63  ;;  %v1571_v3 = vadd.f32 %v1570_v0, %v4045_v22 }
 0x128   : > { %v4099_v4 = vpop.f32.mrf.mxu0 }
 0x129   : > { %v4101_v5 = vpop.f32.mrf.mxu1  ;;  %v4103_v6 = vadd.f32 %v1683_v1, %v1571_v3 }
 0x12a   : > { %v4105_v7 = vpop.f32.mrf.mxu0 }
 0x12b   : > { %v4107_v8 = vpop.f32.mrf.mxu1 }
 0x12c   : > { %v1578_v9 = vpop.f32.mrf.mxu0 }
 0x12d   : > { %v1691_v10 = vpop.f32.mrf.mxu1  ;;  %v1579_v11 = vadd.f32 %v1578_v9, %v4043_v21 }
 0x12e   : > { %v1580_v12 = vpop.f32.mrf.mxu0 }
 0x12f   : > { %v1693_v13 = vpop.f32.mrf.mxu1  ;;  %v4110_v14 = vadd.f32 %v1691_v10, %v1579_v11  ;;  %v1581_v15 = vadd.f32 %v1580_v12, %v4045_v22 }
 0x130   : > { %v4113_v16 = vpop.f32.mrf.mxu0 }
 0x131   : > { %v4115_v17 = vpop.f32.mrf.mxu1  ;;  %v4117_v18 = vadd.f32 %v1693_v13, %v1581_v15 }
 0x132   : > { %v4119_v19 = vpop.f32.mrf.mxu0 }
 0x133   : > { %v4121_v20 = vpop.f32.mrf.mxu1 }
 0x134   : > { %v1588_v23 = vpop.f32.mrf.mxu0 }
 0x135   : > { %v1701_v24 = vpop.f32.mrf.mxu1  ;;  %v1589_v25 = vadd.f32 %v1588_v23, %v4043_v21 }
 0x136   : > { %v1590_v26 = vpop.f32.mrf.mxu0 }
 0x137   : > { %v1703_v27 = vpop.f32.mrf.mxu1  ;;  %v4124_v29 = vadd.f32 %v1701_v24, %v1589_v25  ;;  %v1591_v35 = vadd.f32 %v1590_v26, %v4045_v22 }
 0x138   : > { %v4127_v36 = vpop.f32.mrf.mxu0 }
 0x139   : > { %v4129_v37 = vpop.f32.mrf.mxu1  ;;  %v4131_v38 = vadd.f32 %v1703_v27, %v1591_v35  ;;  %v1543_v27 = vadd.f32 %v4051_v30, %v4043_v21 }
 0x13a   : > { %v4133_v39 = vpop.f32.mrf.mxu0 }
 0x13b   : > { %v4135_v40 = vpop.f32.mrf.mxu1 }
 0x13c   : > { %v1598_v41 = vpop.f32.mrf.mxu0 }
 0x13d   : > { %v1711_v43 = vpop.f32.mrf.mxu1  ;;  %v1599_v49 = vadd.f32 %v1598_v41, %v4043_v21 }
 0x13e   : > { %v1600_v50 = vpop.f32.mrf.mxu0 }
 0x13f   : > { %v1713_v51 = vpop.f32.mrf.mxu1  ;;  %v4138_v52 = vadd.f32 %v1711_v43, %v1599_v49  ;;  %v1601_v53 = vadd.f32 %v1600_v50, %v4045_v22  ;;  %v1545_v43 = vadd.f32 %v4057_v33, %v4045_v22 }
 0x140   : > { %v4141_v55 = vpop.f32.mrf.mxu0 }
 0x141   : > { %v4143_v61 = vpop.f32.mrf.mxu1  ;;  %v4145_v62 = vadd.f32 %v1713_v51, %v1601_v53  ;;  %v1656_v51 = vadd.f32 %v4053_v31, %v1543_v27 }
 0x142   : > { %v4147_v63 = vpop.f32.mrf.mxu0 }
 0x143   : > { %v4149_v0 = vpop.f32.mrf.mxu1 }
 0x144   : > { %v1608_v1 = vpop.f32.mrf.mxu0 }
 0x145   : > { %v1721_v3 = vpop.f32.mrf.mxu1  ;;  %v1609_v9 = vadd.f32 %v1608_v1, %v4043_v21 }
 0x146   : > { %v1610_v10 = vpop.f32.mrf.mxu0 }
 0x147   : > { %v1723_v11 = vpop.f32.mrf.mxu1  ;;  %v4152_v12 = vadd.f32 %v1721_v3, %v1609_v9  ;;  %v1611_v13 = vadd.f32 %v1610_v10, %v4045_v22  ;;  %v1658_v10 = vadd.f32 %v4059_v34, %v1545_v43 }
 0x148   : > { %v4155_v15 = vpop.f32.mrf.mxu0 }
 0x149   : > { %4419 = vst [vmem:[#allocation2_spill] sm:$0xff] %v4152_v12  ;;  %v4157_v23 = vpop.f32.mrf.mxu1  ;;  %v4159_v24 = vadd.f32 %v1723_v11, %v1611_v13 }
 0x14a   : > { %4420 = vst [vmem:[#allocation3_spill] sm:$0xff] %v4157_v23  ;;  %v4161_v25 = vpop.f32.mrf.mxu0 }
 0x14b   : > { %4421 = vst [vmem:[#allocation4_spill] sm:$0xff] %v4159_v24  ;;  %4422 = vst [vmem:[#allocation5_spill] sm:$0xff] %v4161_v25  ;;  %v4163_v26 = vpop.f32.mrf.mxu1 }
 0x14c   : > { %4423 = vst [vmem:[#allocation6_spill] sm:$0xff] %v4163_v26  ;;  %v1764_v35 = vpop.f32.mrf.mxu0  ;;  %v1553_v26 = vadd.f32 %v4071_v44, %v4043_v21 }
 0x14d   : > { %v1877_v41 = vpop.f32.mrf.mxu1  ;;  %v1765_v1 = vadd.f32 %v1764_v35, %v4048_v28 }
 0x14e   : > { %v1766_v49 = vpop.f32.mrf.mxu0  ;;  %v1666_v34 = vadd.f32 %v4073_v45, %v1553_v26 }
 0x14f   : > { %v1879_v50 = vpop.f32.mrf.mxu1  ;;  %v1767_v53 = vadd.f32 %v1766_v49, %v4055_v32  ;;  %v1878_v23 = vadd.f32 %v1877_v41, %v1765_v1  ;;  %v1555_v32 = vadd.f32 %v4077_v47, %v4045_v22 }
 0x150   : > { %v1768_v3 = vpop.f32.mrf.mxu0 }
 0x151   : > { %v1881_v9 = vpop.f32.mrf.mxu1  ;;  %v1769_v11 = vadd.f32 %v1768_v3, %v1656_v51  ;;  %v1880_v12 = vadd.f32 %v1879_v50, %v1767_v53  ;;  %v1956_v44 = vmax.f32 %v1878_v23, 0.0  ;;  %v1668_v1 = vadd.f32 %v4079_v48, %v1555_v32 }
 0x152   : > { %v1770_v13 = vpop.f32.mrf.mxu0 }
 0x153   : > { %v1883_v30 = vpop.f32.mrf.mxu1  ;;  %v1882_v33 = vadd.f32 %v1881_v9, %v1769_v11  ;;  %v1771_v24 = vadd.f32 %v1770_v13, %v1658_v10  ;;  %v1957_v43 = vmax.f32 %v1880_v12, 0.0  ;;  %v1563_v13 = vadd.f32 %v4085_v56, %v4043_v21 }
 0x154   : > { %v1774_v25 = vpop.f32.mrf.mxu0 }
 0x155   : > { %v1887_v31 = vpop.f32.mrf.mxu1  ;;  %v1884_v28 = vadd.f32 %v1883_v30, %v1771_v24  ;;  %v1958_v27 = vmax.f32 %v1882_v33, 0.0  ;;  %v1775_v50 = vadd.f32 %v1774_v25, %v4068_v42  ;;  %v1565_v42 = vadd.f32 %v4091_v59, %v4045_v22 }
 0x156   : > { %v1776_v35 = vpop.f32.mrf.mxu0 }
 0x157   : > { %v1889_v49 = vpop.f32.mrf.mxu1  ;;  %v1959_v51 = vmax.f32 %v1884_v28, 0.0  ;;  %v1777_v3 = vadd.f32 %v1776_v35, %v4075_v46  ;;  %v1988_v47 = vpack.c.bf16 %v1958_v27, %v1956_v44  ;;  %v1888_v46 = vadd.f32 %v1887_v31, %v1775_v50 }
 0x158   : > { %v1778_v53 = vpop.f32.mrf.mxu0  ;;  %v1676_v28 = vadd.f32 %v4087_v57, %v1563_v13 }
 0x159   : > { %v1891_v41 = vpop.f32.mrf.mxu1  ;;  %v1989_v9 = vpack.c.bf16 %v1959_v51, %v1957_v43  ;;  %v1779_v10 = vadd.f32 %v1778_v53, %v1666_v34  ;;  %v1890_v45 = vadd.f32 %v1889_v49, %v1777_v3  ;;  %v1960_v49 = vmax.f32 %v1888_v46, 0.0 }
 0x15a   : > { %v1780_v24 = vpop.f32.mrf.mxu0  ;;  %v1678_v51 = vadd.f32 %v4093_v60, %v1565_v42 }
 0x15b   : > { %v1893_v11 = vpop.f32.mrf.mxu1  ;;  %v1892_v12 = vadd.f32 %v1891_v41, %v1779_v10  ;;  %v1781_v26 = vadd.f32 %v1780_v24, %v1668_v1  ;;  %2171 = vmatprep.mubr.bf16.mxu0 %v1989_v9  ;;  %v1961_v27 = vmax.f32 %v1890_v45, 0.0  ;;  %v1573_v41 = vadd.f32 %v4099_v4, %v4043_v21 }
 0x15c   : > { %v1784_v23 = vpop.f32.mrf.mxu0  ;;  %2172 = vmatmul.mubr.bf16.vlgmr.msra.gmra.mxu0 %v1988_v47 }
 0x15d   : > { %v1897_v30 = vpop.f32.mrf.mxu1  ;;  %v1894_v48 = vadd.f32 %v1893_v11, %v1781_v26  ;;  %v1962_v25 = vmax.f32 %v1892_v12, 0.0  ;;  %v1785_v34 = vadd.f32 %v1784_v23, %v4082_v54  ;;  %v1575_v54 = vadd.f32 %v4105_v7, %v4045_v22 }
 0x15e   : > { %v1786_v33 = vpop.f32.mrf.mxu0  ;;  %v1686_v45 = vadd.f32 %v4101_v5, %v1573_v41 }
 0x15f   : > { %v1899_v32 = vpop.f32.mrf.mxu1  ;;  %v1963_v35 = vmax.f32 %v1894_v48, 0.0  ;;  %v1787_v56 = vadd.f32 %v1786_v33, %v4089_v58  ;;  %v1990_v59 = vpack.c.bf16 %v1962_v25, %v1960_v49  ;;  %v1898_v58 = vadd.f32 %v1897_v30, %v1785_v34 }
 0x160   : > { %v1788_v31 = vpop.f32.mrf.mxu0  ;;  %v1688_v48 = vadd.f32 %v4107_v8, %v1575_v54  ;;  %v1593_v54 = vadd.f32 %v4127_v36, %v4043_v21 }
 0x161   : > { %v1901_v43 = vpop.f32.mrf.mxu1  ;;  %v1991_v3 = vpack.c.bf16 %v1963_v35, %v1961_v27  ;;  %v1789_v44 = vadd.f32 %v1788_v31, %v1676_v28  ;;  %v1900_v57 = vadd.f32 %v1899_v32, %v1787_v56  ;;  %v1964_v46 = vmax.f32 %v1898_v58, 0.0 }
 0x162   : > { %v1790_v50 = vpop.f32.mrf.mxu0  ;;  %v1583_v27 = vadd.f32 %v4113_v16, %v4043_v21 }
 0x163   : > { %v1903_v53 = vpop.f32.mrf.mxu1  ;;  %v1902_v1 = vadd.f32 %v1901_v43, %v1789_v44  ;;  %v1791_v9 = vadd.f32 %v1790_v50, %v1678_v51  ;;  %2179 = vmatprep.mubr.bf16.mxu0 %v1991_v3  ;;  %v1965_v12 = vmax.f32 %v1900_v57, 0.0 }
 0x164   : > { %v1794_v10 = vpop.f32.mrf.mxu0  ;;  %2180 = vmatmul.mubr.bf16.gmra.mxu0 %v1990_v59  ;;  %v1696_v3 = vadd.f32 %v4115_v17, %v1583_v27 }
 0x165   : > { %v1907_v47 = vpop.f32.mrf.mxu1  ;;  %v1904_v60 = vadd.f32 %v1903_v53, %v1791_v9  ;;  %v1966_v24 = vmax.f32 %v1902_v1, 0.0  ;;  %v1795_v23 = vadd.f32 %v1794_v10, %v4096_v2  ;;  %v1585_v2 = vadd.f32 %v4119_v19, %v4045_v22 }
 0x166   : > { %v1796_v11 = vpop.f32.mrf.mxu0 }
 0x167   : > { %v1909_v13 = vpop.f32.mrf.mxu1  ;;  %v1967_v26 = vmax.f32 %v1904_v60, 0.0  ;;  %v1797_v4 = vadd.f32 %v1796_v11, %v4103_v6  ;;  %v1992_v7 = vpack.c.bf16 %v1966_v24, %v1964_v46  ;;  %v1908_v6 = vadd.f32 %v1907_v47, %v1795_v23 }
 0x168   : > { %v1798_v30 = vpop.f32.mrf.mxu0  ;;  %v1698_v1 = vadd.f32 %v4121_v20, %v1585_v2 }
 0x169   : > { %v1911_v42 = vpop.f32.mrf.mxu1  ;;  %v1993_v25 = vpack.c.bf16 %v1967_v26, %v1965_v12  ;;  %v1799_v33 = vadd.f32 %v1798_v30, %v1686_v45  ;;  %v1910_v5 = vadd.f32 %v1909_v13, %v1797_v4  ;;  %v1968_v50 = vmax.f32 %v1908_v6, 0.0 }
 0x16a   : > { %v1800_v32 = vpop.f32.mrf.mxu0  ;;  %v1706_v4 = vadd.f32 %v4129_v37, %v1593_v54 }
 0x16b   : > { %v1913_v28 = vpop.f32.mrf.mxu1  ;;  %v1912_v35 = vadd.f32 %v1911_v42, %v1799_v33  ;;  %v1801_v56 = vadd.f32 %v1800_v32, %v1688_v48  ;;  %2187 = vmatprep.mubr.bf16.mxu0 %v1993_v25  ;;  %v1969_v44 = vmax.f32 %v1910_v5, 0.0  ;;  %v1603_v5 = vadd.f32 %v4141_v55, %v4043_v21 }
 0x16c   : > { %v1804_v49 = vpop.f32.mrf.mxu0  ;;  %2188 = vmatmul.mubr.bf16.gmra.mxu0 %v1992_v7 }
 0x16d   : > { %v1917_v34 = vpop.f32.mrf.mxu1  ;;  %v1914_v8 = vadd.f32 %v1913_v28, %v1801_v56  ;;  %v1970_v31 = vmax.f32 %v1912_v35, 0.0  ;;  %v1805_v53 = vadd.f32 %v1804_v49, %v4110_v14  ;;  %v1595_v14 = vadd.f32 %v4133_v39, %v4045_v22 }
 0x16e   : > { %v1806_v43 = vpop.f32.mrf.mxu0 }
 0x16f   : > { %v1919_v51 = vpop.f32.mrf.mxu1  ;;  %v1971_v59 = vmax.f32 %v1914_v8, 0.0  ;;  %v1807_v16 = vadd.f32 %v1806_v43, %v4117_v18  ;;  %v1994_v19 = vpack.c.bf16 %v1970_v31, %v1968_v50  ;;  %v1918_v18 = vadd.f32 %v1917_v34, %v1805_v53 }
 0x170   : > { %v1808_v41 = vpop.f32.mrf.mxu0  ;;  %v1708_v33 = vadd.f32 %v4135_v40, %v1595_v14  ;;  %v1716_v31 = vadd.f32 %v4143_v61, %v1603_v5 }
 0x171   : > { %v1921_v57 = vpop.f32.mrf.mxu1  ;;  %v1995_v9 = vpack.c.bf16 %v1971_v59, %v1969_v44  ;;  %v1809_v58 = vadd.f32 %v1808_v41, %v1696_v3  ;;  %v1920_v17 = vadd.f32 %v1919_v51, %v1807_v16  ;;  %v1972_v30 = vmax.f32 %v1918_v18, 0.0  ;;  %v4425_v18 = vld [vmem:[#allocation3_spill] sm:$0xff] }
 0x172   : > { %v1810_v10 = vpop.f32.mrf.mxu0 }
 0x173   : > { %v1923_v47 = vpop.f32.mrf.mxu1  ;;  %v1922_v60 = vadd.f32 %v1921_v57, %v1809_v58  ;;  %v1811_v24 = vadd.f32 %v1810_v10, %v1698_v1  ;;  %2195 = vmatprep.mubr.bf16.mxu0 %v1995_v9  ;;  %v1973_v46 = vmax.f32 %v1920_v17, 0.0  ;;  %v1613_v9 = vadd.f32 %v4155_v15, %v4043_v21  ;;  %v4426_v21 = vld [vmem:[#allocation4_spill] sm:$0xff] }
 0x174   : > { %v1814_v11 = vpop.f32.mrf.mxu0  ;;  %2196 = vmatmul.mubr.bf16.gmra.mxu0 %v1994_v19 }
 0x175   : > { %v1927_v13 = vpop.f32.mrf.mxu1  ;;  %v1924_v20 = vadd.f32 %v1923_v47, %v1811_v24  ;;  %v1974_v45 = vmax.f32 %v1922_v60, 0.0  ;;  %v1815_v42 = vadd.f32 %v1814_v11, %v4124_v29  ;;  %v1605_v29 = vadd.f32 %v4147_v63, %v4045_v22 }
 0x176   : > { %v1816_v12 = vpop.f32.mrf.mxu0  ;;  %v1726_v11 = vadd.f32 %v4425_v18, %v1613_v9 }
 0x177   : > { %v1929_v26 = vpop.f32.mrf.mxu1  ;;  %v1975_v23 = vmax.f32 %v1924_v20, 0.0  ;;  %v1817_v36 = vadd.f32 %v1816_v12, %v4131_v38  ;;  %v1996_v39 = vpack.c.bf16 %v1974_v45, %v1972_v30  ;;  %v1928_v38 = vadd.f32 %v1927_v13, %v1815_v42  ;;  %v4427_v45 = vld [vmem:[#allocation2_spill] sm:$0xff] }
 0x178   : > { %v1818_v48 = vpop.f32.mrf.mxu0  ;;  %v1718_v50 = vadd.f32 %v4149_v0, %v1605_v29 }
 0x179   : > { %v1931_v25 = vpop.f32.mrf.mxu1  ;;  %v1997_v7 = vpack.c.bf16 %v1975_v23, %v1973_v46  ;;  %v1819_v32 = vadd.f32 %v1818_v48, %v1706_v4  ;;  %v1930_v37 = vadd.f32 %v1929_v26, %v1817_v36  ;;  %v1976_v3 = vmax.f32 %v1928_v38, 0.0  ;;  %v4428_v46 = vld [vmem:[#allocation6_spill] sm:$0xff]  ;;  %v3400_v38 = vld [vmem:[%s4414_s5 + $0x8] sm:$0xff]  }
 0x17a   : > { %v1820_v28 = vpop.f32.mrf.mxu0  ;;  %3142 = vmatprep.subr.bf16.mxu1 %v3400_v38 }
 0x17b   : > { %v1933_v27 = vpop.f32.mrf.mxu1  ;;  %v1932_v35 = vadd.f32 %v1931_v25, %v1819_v32  ;;  %v1821_v56 = vadd.f32 %v1820_v28, %v1708_v33  ;;  %2203 = vmatprep.mubr.bf16.mxu0 %v1997_v7  ;;  %v1977_v43 = vmax.f32 %v1930_v37, 0.0  ;;  %3143 = vmatpush3.bf16.msra.mxu1 %v3400_v38 }
 0x17c   : > { %v1824_v6 = vpop.f32.mrf.mxu0  ;;  %2204 = vmatmul.mubr.bf16.gmra.mxu0 %v1996_v39 }
 0x17d   : > { %v1937_v49 = vpop.f32.mrf.mxu1  ;;  %v1934_v40 = vadd.f32 %v1933_v27, %v1821_v56  ;;  %v1978_v34 = vmax.f32 %v1932_v35, 0.0  ;;  %v1825_v44 = vadd.f32 %v1824_v6, %v4138_v52  ;;  %v4424_v52 = vld [vmem:[#allocation5_spill] sm:$0xff]  ;;  %v3401_v6 = vld [vmem:[%s4414_s5] sm:$0xff]  }
 0x17e   : > { %v1826_v2 = vpop.f32.mrf.mxu0  ;;  %v1615_v54 = vadd.f32 %v4424_v52, %v4045_v22  ;;  %3144 = vmatprep.subr.bf16.mxu1 %v3401_v6 }
 0x17f   : > { %v1939_v8 = vpop.f32.mrf.mxu1  ;;  %v1979_v51 = vmax.f32 %v1934_v40, 0.0  ;;  %v1827_v55 = vadd.f32 %v1826_v2, %v4145_v62  ;;  %v1998_v63 = vpack.c.bf16 %v1978_v34, %v1976_v3  ;;  %v1938_v62 = vadd.f32 %v1937_v49, %v1825_v44  ;;  %3145 = vmatpush3.bf16.msra.mxu1 %v3401_v6  ;;  %v4238_v34 = vld [vmem:[%s4413_s4] ss:$0 sm:$0xff] }
 0x180   : > { %v1828_v59 = vpop.f32.mrf.mxu0  ;;  %v1728_v23 = vadd.f32 %v4428_v46, %v1615_v54 }
 0x181   : > { %v1941_v16 = vpop.f32.mrf.mxu1  ;;  %v1999_v53 = vpack.c.bf16 %v1979_v51, %v1977_v43  ;;  %v1829_v41 = vadd.f32 %v1828_v59, %v1716_v31  ;;  %v1940_v61 = vadd.f32 %v1939_v8, %v1827_v55  ;;  %v1980_v20 = vmax.f32 %v1938_v62, 0.0 }
 0x182   : > { %v1830_v57 = vpop.f32.mrf.mxu0 }
 0x183   : > { %v1943_v1 = vpop.f32.mrf.mxu1  ;;  %v1942_v58 = vadd.f32 %v1941_v16, %v1829_v41  ;;  %v1831_v19 = vadd.f32 %v1830_v57, %v1718_v50  ;;  %2211 = vmatprep.mubr.bf16.mxu0 %v1999_v53  ;;  %v1981_v13 = vmax.f32 %v1940_v61, 0.0 }
 0x184   : > { %v1834_v10 = vpop.f32.mrf.mxu0  ;;  %2212 = vmatmul.mubr.bf16.gmra.mxu0 %v1998_v63 }
 0x185   : > { %v1947_v47 = vpop.f32.mrf.mxu1  ;;  %v1944_v0 = vadd.f32 %v1943_v1, %v1831_v19  ;;  %v1982_v17 = vmax.f32 %v1942_v58, 0.0  ;;  %v1835_v12 = vadd.f32 %v1834_v10, %v4427_v45 }
 0x186   : > { %v1836_v60 = vpop.f32.mrf.mxu0 }
 0x187   : > { %v1949_v24 = vpop.f32.mrf.mxu1  ;;  %v1983_v14 = vmax.f32 %v1944_v0, 0.0  ;;  %v1837_v15 = vadd.f32 %v1836_v60, %v4426_v21  ;;  %v2000_v22 = vpack.c.bf16 %v1982_v17, %v1980_v20  ;;  %v1948_v7 = vadd.f32 %v1947_v47, %v1835_v12 }
 0x188   : > { %v1838_v26 = vpop.f32.mrf.mxu0 }
 0x189   : > { %v1951_v4 = vpop.f32.mrf.mxu1  ;;  %v2001_v36 = vpack.c.bf16 %v1983_v14, %v1981_v13  ;;  %v1839_v30 = vadd.f32 %v1838_v26, %v1726_v11  ;;  %v1950_v48 = vadd.f32 %v1949_v24, %v1837_v15  ;;  %v1984_v37 = vmax.f32 %v1948_v7, 0.0 }
 0x18a   : > { %v1840_v42 = vpop.f32.mrf.mxu0 }
 0x18b   : > { %v1952_v25 = vadd.f32 %v1951_v4, %v1839_v30  ;;  %v1841_v33 = vadd.f32 %v1840_v42, %v1728_v23  ;;  %2219 = vmatprep.mubr.bf16.mxu0 %v2001_v36  ;;  %v1953_v32 = vpop.f32.mrf.mxu1  ;;  %v1985_v27 = vmax.f32 %v1950_v48, 0.0 }
 0x18c   : > { %2220 = vmatmul.mubr.bf16.gmra.mxu0 %v2000_v22 }
 0x18d   : > { %v1954_v39 = vadd.f32 %v1953_v32, %v1841_v33  ;;  %v1986_v28 = vmax.f32 %v1952_v25, 0.0 }
 0x18f   : > { %v1987_v5 = vmax.f32 %v1954_v39, 0.0  ;;  %v2002_v56 = vpack.c.bf16 %v1986_v28, %v1984_v37 }
 0x191   : > { %v2003_v35 = vpack.c.bf16 %v1987_v5, %v1985_v27 }
 0x193   : > { %2227 = vmatprep.mubr.bf16.mxu0 %v2003_v35 }
 0x194   : > { %2228 = vmatmul.mubr.bf16.gmra.mxu0 %v2002_v56 }
 0x21c   : > { %v3068_v49 = vpop.f32.mrf.mxu0 }
 0x21e   : > { %v3069_v29 = vpop.f32.mrf.mxu0 }
 0x21f   : > { %v3070_v40 = vadd.f32 %v3069_v29, %v3068_v49 }
 0x220   : > { %v3071_v2 = vpop.f32.mrf.mxu0 }
 0x221   : > { %v2174_v31 = vadd.f32 %v3070_v40, %v4238_v34 }
 0x222   : > { %v3072_v8 = vpop.f32.mrf.mxu0 }
 0x223   : > { %v3073_v43 = vadd.f32 %v3072_v8, %v3071_v2  ;;  %v2236_v44 = vmax.f32 %v2174_v31, 0.0 }
 0x224   : > { %v3074_v51 = vpop.f32.mrf.mxu0 }
 0x225   : > { %v2177_v55 = vadd.f32 %v3073_v43, %v4238_v34 }
 0x226   : > { %v3075_v3 = vpop.f32.mrf.mxu0 }
 0x227   : > { %v2237_v59 = vmax.f32 %v2177_v55, 0.0  ;;  %v3076_v16 = vadd.f32 %v3075_v3, %v3074_v51 }
 0x228   : > { %v3077_v50 = vpop.f32.mrf.mxu0 }
 0x229   : > { %v2252_v53 = vpack.c.bf16 %v2237_v59, %v2236_v44  ;;  %v2182_v63 = vadd.f32 %v3076_v16, %v4238_v34 }
 0x22a   : > { %v3078_v41 = vpop.f32.mrf.mxu0 }
 0x22b   : > { %v3079_v57 = vadd.f32 %v3078_v41, %v3077_v50  ;;  %3146 = vmatprep.mubr.msk.bf16.mxu1 %vm2299_vm0, %v2252_v53  ;;  %v2238_v58 = vmax.f32 %v2182_v63, 0.0 }
 0x22c   : > { %v3080_v1 = vpop.f32.mrf.mxu0 }
 0x22d   : > { %v2185_v9 = vadd.f32 %v3079_v57, %v4238_v34 }
 0x22e   : > { %v3081_v61 = vpop.f32.mrf.mxu0 }
 0x22f   : > { %v2239_v19 = vmax.f32 %v2185_v9, 0.0  ;;  %v3082_v62 = vadd.f32 %v3081_v61, %v3080_v1 }
 0x230   : > { %v3083_v10 = vpop.f32.mrf.mxu0 }
 0x231   : > { %v2253_v47 = vpack.c.bf16 %v2239_v19, %v2238_v58  ;;  %v2190_v54 = vadd.f32 %v3082_v62, %v4238_v34 }
 0x232   : > { %v3084_v52 = vpop.f32.mrf.mxu0 }
 0x233   : > { %v3085_v0 = vadd.f32 %v3084_v52, %v3083_v10  ;;  %3147 = vmatmul.mubr.msk.bf16.vlgmr.msra.gmra.mxu1 %vm2299_vm0, %v2253_v47  ;;  %v2240_v18 = vmax.f32 %v2190_v54, 0.0  ;;  %v3402_v47 = vld [vmem:[%s4416_s7 + $0x8] sm:$0xff]   ;;  %v3403_v52 = vld [vmem:[%s4416_s7] sm:$0xff]  }
 0x234   : > { %v3086_v17 = vpop.f32.mrf.mxu0  ;;  %3162 = vmatprep.subr.bf16.mxu1 %v3402_v47 }
 0x235   : > { %v2193_v60 = vadd.f32 %v3085_v0, %v4238_v34  ;;  %3163 = vmatpush3.bf16.msra.mxu1 %v3402_v47 }
 0x236   : > { %v3087_v24 = vpop.f32.mrf.mxu0  ;;  %3164 = vmatprep.subr.bf16.mxu1 %v3403_v52 }
 0x237   : > { %v2241_v11 = vmax.f32 %v2193_v60, 0.0  ;;  %v3088_v13 = vadd.f32 %v3087_v24, %v3086_v17 }
 0x238   : > { %v3089_v14 = vpop.f32.mrf.mxu0 }
 0x239   : > { %v2254_v21 = vpack.c.bf16 %v2241_v11, %v2240_v18  ;;  %v2198_v20 = vadd.f32 %v3088_v13, %v4238_v34  ;;  %3165 = vmatpush3.bf16.msra.mxu1 %v3403_v52 }
 0x23a   : > { %v3090_v15 = vpop.f32.mrf.mxu0 }
 0x23b   : > { %v3091_v45 = vadd.f32 %v3090_v15, %v3089_v14  ;;  %3150 = vmatprep.mubr.msk.bf16.mxu1 %vm2299_vm0, %v2254_v21  ;;  %v2242_v46 = vmax.f32 %v2198_v20, 0.0 }
 0x23c   : > { %v3092_v12 = vpop.f32.mrf.mxu0 }
 0x23d   : > { %v2201_v26 = vadd.f32 %v3091_v45, %v4238_v34 }
 0x23e   : > { %v3093_v4 = vpop.f32.mrf.mxu0 }
 0x23f   : > { %v2243_v23 = vmax.f32 %v2201_v26, 0.0  ;;  %v3094_v36 = vadd.f32 %v3093_v4, %v3092_v12 }
 0x240   : > { %v3095_v30 = vpop.f32.mrf.mxu0 }
 0x241   : > { %v2255_v22 = vpack.c.bf16 %v2243_v23, %v2242_v46  ;;  %v2206_v48 = vadd.f32 %v3094_v36, %v4238_v34 }
 0x242   : > { %v3096_v42 = vpop.f32.mrf.mxu0 }
 0x243   : > { %v3097_v25 = vadd.f32 %v3096_v42, %v3095_v30  ;;  %3151 = vmatmul.mubr.msk.bf16.gmra.mxu1 %vm2299_vm0, %v2255_v22  ;;  %v2244_v39 = vmax.f32 %v2206_v48, 0.0 }
 0x244   : > { %v3098_v33 = vpop.f32.mrf.mxu0 }
 0x245   : > { %v2209_v7 = vadd.f32 %v3097_v25, %v4238_v34 }
 0x246   : > { %v3099_v32 = vpop.f32.mrf.mxu0 }
 0x247   : > { %v2245_v28 = vmax.f32 %v2209_v7, 0.0  ;;  %v3100_v27 = vadd.f32 %v3099_v32, %v3098_v33 }
 0x248   : > { %v3101_v5 = vpop.f32.mrf.mxu0 }
 0x249   : > { %v2256_v37 = vpack.c.bf16 %v2245_v28, %v2244_v39  ;;  %v2214_v56 = vadd.f32 %v3100_v27, %v4238_v34 }
 0x24a   : > { %v3102_v35 = vpop.f32.mrf.mxu0 }
 0x24b   : > { %v3103_v38 = vadd.f32 %v3102_v35, %v3101_v5  ;;  %3154 = vmatprep.mubr.msk.bf16.mxu1 %vm2299_vm0, %v2256_v37  ;;  %v2246_v40 = vmax.f32 %v2214_v56, 0.0 }
 0x24c   : > { %v3104_v6 = vpop.f32.mrf.mxu0 }
 0x24d   : > { %v2217_v49 = vadd.f32 %v3103_v38, %v4238_v34 }
 0x24e   : > { %v3105_v29 = vpop.f32.mrf.mxu0 }
 0x24f   : > { %v2247_v2 = vmax.f32 %v2217_v49, 0.0  ;;  %v3106_v8 = vadd.f32 %v3105_v29, %v3104_v6 }
 0x250   : > { %v3107_v31 = vpop.f32.mrf.mxu0 }
 0x251   : > { %v2257_v43 = vpack.c.bf16 %v2247_v2, %v2246_v40  ;;  %v2222_v55 = vadd.f32 %v3106_v8, %v4238_v34 }
 0x252   : > { %v3108_v51 = vpop.f32.mrf.mxu0 }
 0x253   : > { %v3109_v3 = vadd.f32 %v3108_v51, %v3107_v31  ;;  %3155 = vmatmul.mubr.msk.bf16.gmra.mxu1 %vm2299_vm0, %v2257_v43  ;;  %v2248_v50 = vmax.f32 %v2222_v55, 0.0 }
 0x254   : > { %v3110_v44 = vpop.f32.mrf.mxu0 }
 0x255   : > { %v2225_v59 = vadd.f32 %v3109_v3, %v4238_v34 }
 0x256   : > { %v3111_v16 = vpop.f32.mrf.mxu0 }
 0x257   : > { %v2249_v53 = vmax.f32 %v2225_v59, 0.0  ;;  %v3112_v41 = vadd.f32 %v3111_v16, %v3110_v44 }
 0x258   : > { %v3113_v63 = vpop.f32.mrf.mxu0 }
 0x259   : > { %v2258_v57 = vpack.c.bf16 %v2249_v53, %v2248_v50  ;;  %v2230_v9 = vadd.f32 %v3112_v41, %v4238_v34 }
 0x25a   : > { %v3114_v1 = vpop.f32.mrf.mxu0 }
 0x25b   : > { %v3115_v61 = vadd.f32 %v3114_v1, %v3113_v63  ;;  %3158 = vmatprep.mubr.msk.bf16.mxu1 %vm2299_vm0, %v2258_v57  ;;  %v2250_v19 = vmax.f32 %v2230_v9, 0.0 }
 0x25d   : > { %v2233_v58 = vadd.f32 %v3115_v61, %v4238_v34  ;;  %v3025_v34 = vld [vmem:[%s4415_s6] ss:$0 sm:$0xff] }
 0x25e   : > { %v3038_v61 = vld [vmem:[%s4417_s8] ss:$0 sm:$0xff] }
 0x25f   : > { %v2251_v62 = vmax.f32 %v2233_v58, 0.0 }
 0x261   : > { %v2259_v10 = vpack.c.bf16 %v2251_v62, %v2250_v19 }
 0x263   : > { %3159 = vmatmul.mubr.msk.bf16.gmra.mxu1 %vm2299_vm0, %v2259_v10 }
 0x2f3   : > { %v3148_v54 = vpop.f32.mrf.mxu1 }
 0x2f4   : > { %v2367_v18 = vadd.f32 %v3148_v54, %v3025_v34 }
 0x2f5   : > { %v2358_v0 = vpop.f32.mrf.mxu1 }
 0x2f6   : > { %v2359_v60 = vadd.f32 %v3025_v34, %v2358_v0  ;;  %v2423_v20 = vmax.f32 %v2367_v18, 0.0 }
 0x2f7   : > { %v3149_v17 = vpop.f32.mrf.mxu1 }
 0x2f8   : > { %v2370_v24 = vadd.f32 %v3149_v17, %v3025_v34  ;;  %v2421_v21 = vmax.f32 %v2359_v60, 0.0 }
 0x2f9   : > { %v2361_v11 = vpop.f32.mrf.mxu1 }
 0x2fa   : > { %v2362_v13 = vadd.f32 %v3025_v34, %v2361_v11  ;;  %v2424_v14 = vmax.f32 %v2370_v24, 0.0 }
 0x2fc   : > { %v2422_v15 = vmax.f32 %v2362_v13, 0.0  ;;  %v2438_v12 = vpack.c.bf16 %v2424_v14, %v2423_v20 }
 0x2fe   : > { %v2437_v45 = vpack.c.bf16 %v2422_v15, %v2421_v21 }
 0x300   : > { %3166 = vmatprep.mubr.msk.bf16.mxu1 %vm2468_vm1, %v2437_v45 }
 0x301   : > { %3167 = vmatmul.mubr.msk.bf16.vlgmr.msra.gmra.mxu1 %vm2468_vm1, %v2438_v12 }
 0x303   : > { %v3152_v26 = vpop.f32.mrf.mxu1 }
 0x304   : > { %v2383_v30 = vadd.f32 %v3152_v26, %v3025_v34 }
 0x305   : > { %v2374_v4 = vpop.f32.mrf.mxu1 }
 0x306   : > { %v2375_v23 = vadd.f32 %v3025_v34, %v2374_v4  ;;  %v2427_v7 = vmax.f32 %v2383_v30, 0.0 }
 0x307   : > { %v3153_v46 = vpop.f32.mrf.mxu1 }
 0x308   : > { %v2386_v36 = vadd.f32 %v3153_v46, %v3025_v34  ;;  %v2425_v25 = vmax.f32 %v2375_v23, 0.0 }
 0x309   : > { %v2377_v22 = vpop.f32.mrf.mxu1 }
 0x30a   : > { %v2378_v42 = vadd.f32 %v3025_v34, %v2377_v22  ;;  %v2428_v48 = vmax.f32 %v2386_v36, 0.0 }
 0x30c   : > { %v2426_v33 = vmax.f32 %v2378_v42, 0.0  ;;  %v2440_v39 = vpack.c.bf16 %v2428_v48, %v2427_v7 }
 0x30e   : > { %v2439_v32 = vpack.c.bf16 %v2426_v33, %v2425_v25 }
 0x310   : > { %3170 = vmatprep.mubr.msk.bf16.mxu1 %vm2468_vm1, %v2439_v32 }
 0x311   : > { %3171 = vmatmul.mubr.msk.bf16.gmra.mxu1 %vm2468_vm1, %v2440_v39 }
 0x313   : > { %v3156_v28 = vpop.f32.mrf.mxu1 }
 0x314   : > { %v2399_v56 = vadd.f32 %v3156_v28, %v3025_v34 }
 0x315   : > { %v2390_v27 = vpop.f32.mrf.mxu1 }
 0x316   : > { %v2391_v37 = vadd.f32 %v3025_v34, %v2390_v27  ;;  %v2431_v2 = vmax.f32 %v2399_v56, 0.0 }
 0x317   : > { %v3157_v5 = vpop.f32.mrf.mxu1 }
 0x318   : > { %v2402_v35 = vadd.f32 %v3157_v5, %v3025_v34  ;;  %v2429_v29 = vmax.f32 %v2391_v37, 0.0 }
 0x319   : > { %v2393_v38 = vpop.f32.mrf.mxu1 }
 0x31a   : > { %v2394_v6 = vadd.f32 %v3025_v34, %v2393_v38  ;;  %v2432_v49 = vmax.f32 %v2402_v35, 0.0 }
 0x31c   : > { %v2430_v40 = vmax.f32 %v2394_v6, 0.0  ;;  %v2442_v31 = vpack.c.bf16 %v2432_v49, %v2431_v2 }
 0x31e   : > { %v2441_v8 = vpack.c.bf16 %v2430_v40, %v2429_v29 }
 0x320   : > { %3174 = vmatprep.mubr.msk.bf16.mxu1 %vm2468_vm1, %v2441_v8 }
 0x321   : > { %3175 = vmatmul.mubr.msk.bf16.gmra.mxu1 %vm2468_vm1, %v2442_v31 }
 0x323   : > { %v3160_v43 = vpop.f32.mrf.mxu1 }
 0x324   : > { %v2415_v59 = vadd.f32 %v3160_v43, %v3025_v34 }
 0x325   : > { %v2406_v51 = vpop.f32.mrf.mxu1 }
 0x326   : > { %v2407_v3 = vadd.f32 %v3025_v34, %v2406_v51  ;;  %v2435_v57 = vmax.f32 %v2415_v59, 0.0 }
 0x327   : > { %v3161_v55 = vpop.f32.mrf.mxu1 }
 0x328   : > { %v2418_v44 = vadd.f32 %v3161_v55, %v3025_v34  ;;  %v2433_v41 = vmax.f32 %v2407_v3, 0.0 }
 0x329   : > { %v2409_v16 = vpop.f32.mrf.mxu1 }
 0x32a   : > { %v2410_v50 = vadd.f32 %v3025_v34, %v2409_v16  ;;  %v2436_v53 = vmax.f32 %v2418_v44, 0.0 }
 0x32c   : > { %v2434_v63 = vmax.f32 %v2410_v50, 0.0  ;;  %v2444_v9 = vpack.c.bf16 %v2436_v53, %v2435_v57 }
 0x32e   : > { %v2443_v1 = vpack.c.bf16 %v2434_v63, %v2433_v41 }
 0x330   : > { %3178 = vmatprep.mubr.msk.bf16.mxu1 %vm2468_vm1, %v2443_v1 }
 0x331   : > { %3179 = vmatmul.mubr.msk.bf16.gmra.mxu1 %vm2468_vm1, %v2444_v9 }
 0x3c1   : > { %v3168_v58 = vpop.f32.mrf.mxu1 }
 0x3c2   : > { %v2536_v19 = vadd.f32 %v3168_v58, %v3038_v61 }
 0x3c3   : > { %v2527_v62 = vpop.f32.mrf.mxu1 }
 0x3c4   : > { %v2528_v10 = vadd.f32 %v3038_v61, %v2527_v62  ;;  %2594 = vmax.xlane.f32.xlu1 %v2536_v19 }
 0x3c5   : > { %v3169_v47 = vpop.f32.mrf.mxu1 }
 0x3c6   : > { %v2539_v52 = vadd.f32 %v3169_v47, %v3038_v61  ;;  %2590 = vmax.xlane.f32.xlu0 %v2528_v10 }
 0x3c7   : > { %v2530_v54 = vpop.f32.mrf.mxu1 }
 0x3c8   : > { %v2531_v0 = vadd.f32 %v3038_v61, %v2530_v54  ;;  %2596 = vmax.xlane.f32.xlu1 %v2539_v52 }
 0x3ca   : > { %2592 = vmax.xlane.f32.xlu0 %v2531_v0 }
 0x3d1   : > { %v3172_v34 = vpop.f32.mrf.mxu1 }
 0x3d2   : > { %v2552_v17 = vadd.f32 %v3172_v34, %v3038_v61 }
 0x3d3   : > { %v2543_v60 = vpop.f32.mrf.mxu1 }
 0x3d4   : > { %2602 = vmax.xlane.f32.xlu0 %v2552_v17  ;;  %v2544_v18 = vadd.f32 %v3038_v61, %v2543_v60 }
 0x3d5   : > { %v3173_v24 = vpop.f32.mrf.mxu1 }
 0x3d6   : > { %v2555_v11 = vadd.f32 %v3173_v24, %v3038_v61 }
 0x3d7   : > { %v2546_v13 = vpop.f32.mrf.mxu1 }
 0x3d8   : > { %2604 = vmax.xlane.f32.xlu1 %v2555_v11  ;;  %2598 = vmax.xlane.f32.xlu0 %v2544_v18  ;;  %v4284_v14 = vadd.f32 %v3038_v61, %v2546_v13 }
 0x3dc   : > { %2600 = vmax.xlane.f32.xlu1 %v4284_v14 }
 0x3e1   : > { %v3176_v21 = vpop.f32.mrf.mxu1 }
 0x3e2   : > { %v4287_v15 = vadd.f32 %v3176_v21, %v3038_v61 }
 0x3e3   : > { %v2559_v20 = vpop.f32.mrf.mxu1 }
 0x3e4   : > { %2610 = vmax.xlane.f32.xlu0 %v4287_v15  ;;  %v4290_v12 = vadd.f32 %v3038_v61, %v2559_v20 }
 0x3e5   : > { %v3177_v45 = vpop.f32.mrf.mxu1 }
 0x3e6   : > { %v4292_v26 = vadd.f32 %v3177_v45, %v3038_v61 }
 0x3e7   : > { %v2562_v4 = vpop.f32.mrf.mxu1 }
 0x3e8   : > { %2612 = vmax.xlane.f32.xlu1 %v4292_v26  ;;  %2606 = vmax.xlane.f32.xlu0 %v4290_v12  ;;  %v4296_v46 = vadd.f32 %v3038_v61, %v2562_v4 }
 0x3ec   : > { %2608 = vmax.xlane.f32.xlu1 %v4296_v46 }
 0x3f1   : > { %v3180_v23 = vpop.f32.mrf.mxu1 }
 0x3f2   : > { %v4302_v48 = vadd.f32 %v3180_v23, %v3038_v61 }
 0x3f3   : > { %v2575_v36 = vpop.f32.mrf.mxu1 }
 0x3f4   : > { %v4299_v30 = vadd.f32 %v3038_v61, %v2575_v36 }
 0x3f5   : > { %v3181_v22 = vpop.f32.mrf.mxu1 }
 0x3f6   : > { %2614 = vmax.xlane.f32.xlu0 %v4299_v30  ;;  %v4308_v33 = vadd.f32 %v3181_v22, %v3038_v61 }
 0x3f7   : > { %v2578_v42 = vpop.f32.mrf.mxu1 }
 0x3f8   : > { %v4304_v25 = vadd.f32 %v3038_v61, %v2578_v42 }
 0x3fa   : > { %2616 = vmax.xlane.f32.xlu1 %v4304_v25  ;;  %2618 = vmax.xlane.f32.xlu0 %v4302_v48 }
 0x3fe   : > { %2620 = vmax.xlane.f32.xlu1 %v4308_v33 }
 0x44d   : > { %v2595_v7 = vpop.xlane.xlu1 %2594 }
 0x44e   : > { %v2624_v32 = vsub.f32 %v2536_v19, %v2595_v7 }
 0x44f   : > { %v2591_v39 = vpop.xlane.xlu0 %2590 }
 0x450   : > { %v2642_v28 = vmul.f32 1.442695, %v2624_v32  ;;  %v2622_v27 = vsub.f32 %v2528_v10, %v2591_v39 }
 0x451   : > { %v2597_v5 = vpop.xlane.xlu1 %2596 }
 0x452   : > { %3404 = vpow2.f32 %v2642_v28  ;;  %v2638_v37 = vmul.f32 1.442695, %v2622_v27  ;;  %v2625_v35 = vsub.f32 %v2539_v52, %v2597_v5 }
 0x453   : > { %v2593_v56 = vpop.xlane.xlu0 %2592 }
 0x454   : > { %v2644_v38 = vmul.f32 1.442695, %v2625_v35  ;;  %v2623_v6 = vsub.f32 %v2531_v0, %v2593_v56  ;;  %3406 = vpow2.f32 %v2638_v37 }
 0x456   : > { %3408 = vpow2.f32 %v2644_v38  ;;  %v2640_v49 = vmul.f32 1.442695, %v2623_v6 }
 0x458   : > { %3410 = vpow2.f32 %v2640_v49 }
 0x45d   : > { %v2603_v29 = vpop.xlane.xlu0 %2602 }
 0x45e   : > { %v2628_v40 = vsub.f32 %v2552_v17, %v2603_v29 }
 0x45f   : > { %v4311_v2 = vpop.eup %3404 }
 0x460   : > { %v2650_v8 = vmul.f32 1.442695, %v2628_v40  ;;  %2674 = vadd.xlane.f32.xlu0 %v4311_v2 }
 0x461   : > { %v2605_v31 = vpop.xlane.xlu1 %2604  ;;  %v2599_v43 = vpop.xlane.xlu0 %2598 }
 0x462   : > { %v4314_v51 = vpop.eup %3406  ;;  %3412 = vpow2.f32 %v2650_v8  ;;  %v2629_v55 = vsub.f32 %v2555_v11, %v2605_v31  ;;  %v2626_v3 = vsub.f32 %v2544_v18, %v2599_v43 }
 0x463   : > { %v4316_v44 = vpop.eup %3408 }
 0x464   : > { %v2652_v59 = vmul.f32 1.442695, %v2629_v55  ;;  %v2646_v16 = vmul.f32 1.442695, %v2626_v3  ;;  %2676 = vadd.xlane.f32.xlu1 %v4316_v44  ;;  %2670 = vadd.xlane.f32.xlu0 %v4314_v51 }
 0x465   : > { %v2601_v50 = vpop.xlane.xlu1 %2600  ;;  %v4321_v41 = vpop.eup %3410 }
 0x466   : > { %3414 = vpow2.f32 %v2652_v59  ;;  %v2627_v53 = vsub.f32 %v4284_v14, %v2601_v50 }
 0x467   : > { %3416 = vpow2.f32 %v2646_v16 }
 0x468   : > { %v2648_v63 = vmul.f32 1.442695, %v2627_v53  ;;  %2672 = vadd.xlane.f32.xlu1 %v4321_v41 }
 0x46a   : > { %3418 = vpow2.f32 %v2648_v63 }
 0x46d   : > { %v2611_v57 = vpop.xlane.xlu0 %2610 }
 0x46e   : > { %v2632_v1 = vsub.f32 %v4287_v15, %v2611_v57 }
 0x46f   : > { %v4325_v9 = vpop.eup %3412 }
 0x470   : > { %v2658_v61 = vmul.f32 1.442695, %v2632_v1  ;;  %2682 = vadd.xlane.f32.xlu0 %v4325_v9 }
 0x471   : > { %v2613_v58 = vpop.xlane.xlu1 %2612  ;;  %v2607_v19 = vpop.xlane.xlu0 %2606 }
 0x472   : > { %3420 = vpow2.f32 %v2658_v61  ;;  %v2633_v62 = vsub.f32 %v4292_v26, %v2613_v58  ;;  %v2630_v10 = vsub.f32 %v4290_v12, %v2607_v19 }
 0x473   : > { %v4330_v47 = vpop.eup %3414 }
 0x474   : > { %v4332_v52 = vpop.eup %3416  ;;  %v2660_v54 = vmul.f32 1.442695, %v2633_v62  ;;  %v2654_v0 = vmul.f32 1.442695, %v2630_v10  ;;  %2684 = vadd.xlane.f32.xlu1 %v4330_v47 }
 0x475   : > { %2678 = vadd.xlane.f32.xlu0 %v4332_v52  ;;  %v2609_v34 = vpop.xlane.xlu1 %2608 }
 0x476   : > { %3422 = vpow2.f32 %v2660_v54  ;;  %v2631_v17 = vsub.f32 %v4296_v46, %v2609_v34 }
 0x477   : > { %v4337_v60 = vpop.eup %3418  ;;  %3424 = vpow2.f32 %v2654_v0 }
 0x478   : > { %v2656_v24 = vmul.f32 1.442695, %v2631_v17  ;;  %2680 = vadd.xlane.f32.xlu1 %v4337_v60 }
 0x47a   : > { %3426 = vpow2.f32 %v2656_v24 }
 0x47f   : > { %v4340_v18 = vpop.eup %3420  ;;  %v2615_v11 = vpop.xlane.xlu0 %2614 }
 0x480   : > { %v2634_v13 = vsub.f32 %v4299_v30, %v2615_v11  ;;  %2690 = vadd.xlane.f32.xlu0 %v4340_v18 }
 0x482   : > { %v2662_v14 = vmul.f32 1.442695, %v2634_v13 }
 0x483   : > { %v4344_v21 = vpop.eup %3422  ;;  %v2617_v15 = vpop.xlane.xlu1 %2616 }
 0x484   : > { %v2619_v20 = vpop.xlane.xlu0 %2618  ;;  %v4346_v45 = vpop.eup %3424  ;;  %3428 = vpow2.f32 %v2662_v14  ;;  %v2635_v12 = vsub.f32 %v4304_v25, %v2617_v15  ;;  %2692 = vadd.xlane.f32.xlu1 %v4344_v21 }
 0x485   : > { %v2636_v26 = vsub.f32 %v4302_v48, %v2619_v20  ;;  %2686 = vadd.xlane.f32.xlu0 %v4346_v45 }
 0x486   : > { %v2664_v4 = vmul.f32 1.442695, %v2635_v12 }
 0x487   : > { %v2666_v46 = vmul.f32 1.442695, %v2636_v26  ;;  %v4352_v23 = vpop.eup %3426  ;;  %v2621_v36 = vpop.xlane.xlu1 %2620 }
 0x488   : > { %3430 = vpow2.f32 %v2664_v4  ;;  %v2637_v30 = vsub.f32 %v4308_v33, %v2621_v36  ;;  %2688 = vadd.xlane.f32.xlu1 %v4352_v23 }
 0x489   : > { %3432 = vpow2.f32 %v2666_v46 }
 0x48a   : > { %v2668_v22 = vmul.f32 1.442695, %v2637_v30 }
 0x48c   : > { %3434 = vpow2.f32 %v2668_v22 }
 0x491   : > { %v4356_v42 = vpop.eup %3428 }
 0x492   : > { %2694 = vadd.xlane.f32.xlu0 %v4356_v42 }
 0x495   : > { %v4359_v48 = vpop.eup %3430 }
 0x496   : > { %v4361_v25 = vpop.eup %3432  ;;  %2696 = vadd.xlane.f32.xlu1 %v4359_v48 }
 0x497   : > { %2698 = vadd.xlane.f32.xlu0 %v4361_v25 }
 0x499   : > { %v4365_v7 = vpop.eup %3434 }
 0x49a   : > { %2700 = vadd.xlane.f32.xlu1 %v4365_v7 }
 0x4e9   : > { %v2675_v33 = vpop.xlane.xlu0 %2674 }
 0x4ea   : > { %3436 = vrcp.f32 %v2675_v33 }
 0x4ed   : > { %v2677_v32 = vpop.xlane.xlu1 %2676  ;;  %v2671_v39 = vpop.xlane.xlu0 %2670 }
 0x4ee   : > { %3438 = vrcp.f32 %v2677_v32 }
 0x4ef   : > { %3440 = vrcp.f32 %v2671_v39 }
 0x4f1   : > { %v2673_v28 = vpop.xlane.xlu1 %2672 }
 0x4f2   : > { %3442 = vrcp.f32 %v2673_v28 }
 0x4f7   : > { %v3437_v27 = vpop.eup %3436 }
 0x4f8   : > { %v2720_v5 = vmul.f32 %v3437_v27, %v4311_v2 }
 0x4f9   : > { %v2683_v37 = vpop.xlane.xlu0 %2682 }
 0x4fa   : > { %2736 = vst [vmem:[%s4372_s26 + $0x10] sm:$0xff] %v2720_v5  ;;  %3444 = vrcp.f32 %v2683_v37 }
 0x4fb   : > { %v3439_v35 = vpop.eup %3438 }
 0x4fc   : > { %v3441_v56 = vpop.eup %3440  ;;  %v2721_v38 = vmul.f32 %v3439_v35, %v4316_v44 }
 0x4fd   : > { %v2718_v6 = vmul.f32 %v3441_v56, %v4314_v51  ;;  %v2685_v49 = vpop.xlane.xlu1 %2684 }
 0x4fe   : > { %2737 = vst [vmem:[%s4372_s26 + $0x18] sm:$0xff] %v2721_v38  ;;  %3446 = vrcp.f32 %v2685_v49  ;;  %v2679_v29 = vpop.xlane.xlu0 %2678 }
 0x4ff   : > { %v3443_v40 = vpop.eup %3442  ;;  %2734 = vst [vmem:[%s4372_s26] sm:$0xff] %v2718_v6  ;;  %3448 = vrcp.f32 %v2679_v29 }
 0x500   : > { %v2719_v2 = vmul.f32 %v3443_v40, %v4321_v41 }
 0x501   : > { %v2681_v8 = vpop.xlane.xlu1 %2680 }
 0x502   : > { %2735 = vst [vmem:[%s4372_s26 + $0x8] sm:$0xff] %v2719_v2  ;;  %3450 = vrcp.f32 %v2681_v8 }
 0x507   : > { %v3445_v31 = vpop.eup %3444 }
 0x508   : > { %v2724_v43 = vmul.f32 %v3445_v31, %v4325_v9 }
 0x509   : > { %v2691_v55 = vpop.xlane.xlu0 %2690 }
 0x50a   : > { %2740 = vst [vmem:[%s4372_s26 + $0x30] sm:$0xff] %v2724_v43  ;;  %3452 = vrcp.f32 %v2691_v55 }
 0x50b   : > { %v3447_v51 = vpop.eup %3446 }
 0x50c   : > { %v3449_v3 = vpop.eup %3448  ;;  %v2725_v44 = vmul.f32 %v3447_v51, %v4330_v47 }
 0x50d   : > { %v2722_v59 = vmul.f32 %v3449_v3, %v4332_v52  ;;  %v2693_v16 = vpop.xlane.xlu1 %2692 }
 0x50e   : > { %2741 = vst [vmem:[%s4372_s26 + $0x38] sm:$0xff] %v2725_v44  ;;  %3454 = vrcp.f32 %v2693_v16  ;;  %v2687_v50 = vpop.xlane.xlu0 %2686 }
 0x50f   : > { %v3451_v53 = vpop.eup %3450  ;;  %2738 = vst [vmem:[%s4372_s26 + $0x20] sm:$0xff] %v2722_v59  ;;  %3456 = vrcp.f32 %v2687_v50 }
 0x510   : > { %v2723_v41 = vmul.f32 %v3451_v53, %v4337_v60 }
 0x511   : > { %v2689_v63 = vpop.xlane.xlu1 %2688 }
 0x512   : > { %2739 = vst [vmem:[%s4372_s26 + $0x28] sm:$0xff] %v2723_v41  ;;  %3458 = vrcp.f32 %v2689_v63 }
 0x517   : > { %v3453_v57 = vpop.eup %3452 }
 0x518   : > { %v2728_v1 = vmul.f32 %v3453_v57, %v4340_v18 }
 0x51a   : > { %2744 = vst [vmem:[%s4372_s26 + $0x50] sm:$0xff] %v2728_v1 }
 0x51b   : > { %v3455_v9 = vpop.eup %3454  ;;  %v2695_v61 = vpop.xlane.xlu0 %2694 }
 0x51c   : > { %v3457_v58 = vpop.eup %3456  ;;  %v2729_v19 = vmul.f32 %v3455_v9, %v4344_v21  ;;  %3460 = vrcp.f32 %v2695_v61 }
 0x51d   : > { %v2726_v62 = vmul.f32 %v3457_v58, %v4346_v45 }
 0x51e   : > { %2745 = vst [vmem:[%s4372_s26 + $0x58] sm:$0xff] %v2729_v19 }
 0x51f   : > { %v3459_v10 = vpop.eup %3458  ;;  %2742 = vst [vmem:[%s4372_s26 + $0x40] sm:$0xff] %v2726_v62  ;;  %v2697_v47 = vpop.xlane.xlu1 %2696 }
 0x520   : > { %v2727_v52 = vmul.f32 %v3459_v10, %v4352_v23  ;;  %3462 = vrcp.f32 %v2697_v47  ;;  %v2699_v54 = vpop.xlane.xlu0 %2698 }
 0x521   : > { %3464 = vrcp.f32 %v2699_v54 }
 0x522   : > { %2743 = vst [vmem:[%s4372_s26 + $0x48] sm:$0xff] %v2727_v52 }
 0x523   : > { %v2701_v0 = vpop.xlane.xlu1 %2700 }
 0x524   : > { %3466 = vrcp.f32 %v2701_v0 }
 0x529   : > { %v3461_v34 = vpop.eup %3460 }
 0x52a   : > { %v2730_v17 = vmul.f32 %v3461_v34, %v4356_v42 }
 0x52c   : > { %2746 = vst [vmem:[%s4372_s26 + $0x60] sm:$0xff] %v2730_v17 }
 0x52d   : > { %v3463_v60 = vpop.eup %3462 }
 0x52e   : > { %v3465_v24 = vpop.eup %3464  ;;  %v2731_v18 = vmul.f32 %v3463_v60, %v4359_v48 }
 0x52f   : > { %v2732_v11 = vmul.f32 %v3465_v24, %v4361_v25 }
 0x530   : > { %2747 = vst [vmem:[%s4372_s26 + $0x68] sm:$0xff] %v2731_v18 }
 0x531   : > { %v3467_v13 = vpop.eup %3466  ;;  %2748 = vst [vmem:[%s4372_s26 + $0x70] sm:$0xff] %v2732_v11 }
 0x532   : > { %v2733_v14 = vmul.f32 %v3467_v13, %v4365_v7 }
 0x534   : > { %2749 = vst [vmem:[%s4372_s26 + $0x78] sm:$0xff] %v2733_v14 }
 0x535 PF: > { %s19_s30 = sadd.s32 1, %s3474_s30  }
 0x536   : > { %p16_p4 = scmp.ge.s32.totalorder %s19_s30, 4  }
 0x538   :  { %18 = sbr.rel (!%p16_p4) target bundleno = 1 (0x1), region = 86 }

</bundles_post_ra>
